<compile_context>
chip_gen: v6e
topology: v6e:2x2x1
jax: 0.10.0
libtpu: 0.0.40
codegen_flags: <defaults>
</compile_context>

<pallas_src>
import functools
import math

import jax
import jax.numpy as jnp
from jax import lax
from jax.experimental import pallas as pl
from jax.experimental.pallas import tpu as pltpu


def _layer_norm(v, gamma, beta, eps):
    mu = jnp.mean(v, axis=-1, keepdims=True)
    var = jnp.mean((v - mu) ** 2, axis=-1, keepdims=True)
    return (v - mu) * lax.rsqrt(var + eps) * gamma + beta


def _policy_head_kernel(
    x_ref, amap_ref,
    kv_w_ref, kv_b_ref,
    q_w_ref, q_b_ref,
    pe_enc_w_ref, pe_enc_b_ref, pe_ln1_g_ref, pe_ln1_b_ref,
    pe_lin_w_ref, pe_lin_b_ref, pe_ln2_g_ref, pe_ln2_b_ref,
    pe_dec_w_ref, pe_dec_b_ref,
    out_w_ref, out_b_ref, ln_g_ref, ln_b_ref,
    pol_w_ref, pol_b_ref,
    out_ref,
    *, num_heads, head_dim, p_enc_dim, eps):
    f32 = jnp.float32
    x = x_ref[...]                                                           # (S, Din)

    # kv / q projections (q comes from the constant attention map).
    kv = jnp.dot(x, kv_w_ref[...], preferred_element_type=f32) + kv_b_ref[...]          # (S, 2M)
    q = jnp.dot(amap_ref[...], q_w_ref[...], preferred_element_type=f32) + q_b_ref[...]  # (S, M)

    # PositionalEncoding trunk (shared across heads).
    pe = jnp.dot(x, pe_enc_w_ref[...], preferred_element_type=f32) + pe_enc_b_ref[...]   # (S, P)
    pe = _layer_norm(pe, pe_ln1_g_ref[...], pe_ln1_b_ref[...], eps)
    pe = jnp.dot(pe, pe_lin_w_ref[...], preferred_element_type=f32) + pe_lin_b_ref[...]  # (S, H*P)

    w_out = out_w_ref[...]                                                   # (M, Din)
    scale = 1.0 / math.sqrt(head_dim)
    s = x.shape[0]
    din = w_out.shape[1]

    # Per-head attention. out_linear is fused into the head loop:
    #   out_linear(concat_h ctx_h) == sum_h ctx_h @ W_out[h*hd:(h+1)*hd, :]
    # which avoids any in-kernel (S, H, hd) reshape / concatenate.
    acc = jnp.zeros((s, din), f32)
    for h in range(num_heads):
        k_h = kv[:, 2 * head_dim * h: 2 * head_dim * h + head_dim]           # (S, hd)
        v_h = kv[:, 2 * head_dim * h + head_dim: 2 * head_dim * (h + 1)]     # (S, hd)
        q_h = q[:, head_dim * h: head_dim * (h + 1)]                         # (S, hd)

        # q_h @ k_h^T without an explicit transpose (contract last dims).
        logits = lax.dot_general(q_h, k_h, (((1,), (1,)), ((), ())),
                                 preferred_element_type=f32) * scale         # (S, S)

        # Per-head positional-encoding bias added to the logits.
        pe_h = pe[:, p_enc_dim * h: p_enc_dim * (h + 1)]                     # (S, P)
        pe_h = _layer_norm(pe_h, pe_ln2_g_ref[...], pe_ln2_b_ref[...], eps)
        pe_h = jnp.dot(pe_h, pe_dec_w_ref[...],
                       preferred_element_type=f32) + pe_dec_b_ref[...]       # (S, S)

        logits = logits + pe_h
        logits = logits - jnp.max(logits, axis=-1, keepdims=True)
        p = jnp.exp(logits)
        p = p / jnp.sum(p, axis=-1, keepdims=True)                           # softmax

        ctx_h = jnp.dot(p, v_h, preferred_element_type=f32)                  # (S, hd)
        acc = acc + jnp.dot(ctx_h, w_out[head_dim * h: head_dim * (h + 1), :],
                            preferred_element_type=f32)                      # (S, Din)

    out = acc + out_b_ref[...] + x                                           # out_linear + residual
    out = _layer_norm(out, ln_g_ref[...], ln_b_ref[...], eps)
    out = jnp.maximum(out, 0.0)
    out_ref[...] = jnp.dot(out, pol_w_ref[...],
                           preferred_element_type=f32) + pol_b_ref[...]      # (S, policy_dim)


def policy_head_forward(x, params, attention_map, *, seq_len, input_dim,
                        model_dim, num_heads, policy_dim, p_enc_dim):
    """x: (B, seq_len, input_dim) f32 -> (B, seq_len*policy_dim) f32."""
    B = x.shape[0]
    assert x.shape == (B, seq_len, input_dim)
    head_dim = model_dim // num_heads
    assert model_dim == num_heads * head_dim

    weight_args = [
        params["kv_w"], params["kv_b"],
        params["q_w"], params["q_b"],
        params["pe_enc_w"], params["pe_enc_b"],
        params["pe_ln1_g"], params["pe_ln1_b"],
        params["pe_lin_w"], params["pe_lin_b"],
        params["pe_ln2_g"], params["pe_ln2_b"],
        params["pe_dec_w"], params["pe_dec_b"],
        params["out_w"], params["out_b"],
        params["ln_g"], params["ln_b"],
        params["pol_w"], params["pol_b"],
    ]

    # Weights / biases / attention map: full-array 2-D blocks with a constant
    # index_map -> DMA'd once, VMEM-resident across the whole batch grid.
    def resident(a):
        return pl.BlockSpec(a.shape, lambda b: (0, 0))

    kernel = functools.partial(
        _policy_head_kernel, num_heads=num_heads, head_dim=head_dim,
        p_enc_dim=p_enc_dim, eps=1e-5)

    out = pl.pallas_call(
        kernel,
        out_shape=jax.ShapeDtypeStruct((B, seq_len, policy_dim), jnp.float32),
        grid=(B,),
        in_specs=[pl.BlockSpec((None, seq_len, input_dim), lambda b: (b, 0, 0)),
                  resident(attention_map)] + [resident(w) for w in weight_args],
        out_specs=pl.BlockSpec((None, seq_len, policy_dim), lambda b: (b, 0, 0)),
        compiler_params=pltpu.CompilerParams(
            dimension_semantics=("parallel",)),
    )(x, attention_map, *weight_args)

    # nn.Flatten(): (B, S, policy_dim) -> (B, S*policy_dim) outside the kernel
    # (row-major, identical to the torch flatten semantics).
    return out.reshape(B, seq_len * policy_dim)


def init_params(key, *, seq_len, input_dim, model_dim, num_heads, policy_dim,
                p_enc_dim, map_dim):
    """torch-like init; weights stored pre-transposed (fan_in, fan_out)."""
    keys = iter(jax.random.split(key, 16))

    def linear(fan_in, fan_out):
        kw, kb = jax.random.split(next(keys))
        bound = 1.0 / math.sqrt(fan_in)
        w = jax.random.uniform(kw, (fan_in, fan_out), jnp.float32, -bound, bound)
        b = jax.random.uniform(kb, (1, fan_out), jnp.float32, -bound, bound)
        return w, b

    def layernorm(n):
        kg, kb = jax.random.split(next(keys))
        g = 1.0 + 0.1 * jax.random.normal(kg, (1, n), jnp.float32)
        b = 0.1 * jax.random.normal(kb, (1, n), jnp.float32)
        return g, b

    p = {}
    p["kv_w"], p["kv_b"] = linear(input_dim, 2 * model_dim)
    p["q_w"], p["q_b"] = linear(map_dim, model_dim)
    p["pe_enc_w"], p["pe_enc_b"] = linear(input_dim, p_enc_dim)
    p["pe_ln1_g"], p["pe_ln1_b"] = layernorm(p_enc_dim)
    p["pe_lin_w"], p["pe_lin_b"] = linear(p_enc_dim, num_heads * p_enc_dim)
    p["pe_ln2_g"], p["pe_ln2_b"] = layernorm(p_enc_dim)
    p["pe_dec_w"], p["pe_dec_b"] = linear(p_enc_dim, seq_len)
    p["out_w"], p["out_b"] = linear(model_dim, input_dim)
    p["ln_g"], p["ln_b"] = layernorm(input_dim)
    p["pol_w"], p["pol_b"] = linear(input_dim, policy_dim)
    return p


def reference_forward(x, params, attention_map, *, seq_len, model_dim,
                      num_heads, policy_dim, p_enc_dim):
    """Pure-JAX mirror of the PyTorch PolicyHead.forward (weights pre-transposed)."""
    B = x.shape[0]
    hd = model_dim // num_heads
    eps = 1e-5

    def ln(v, g, b):
        mu = jnp.mean(v, -1, keepdims=True)
        var = jnp.mean((v - mu) ** 2, -1, keepdims=True)
        return (v - mu) / jnp.sqrt(var + eps) * g + b

    residual = x
    kv = x @ params["kv_w"] + params["kv_b"]
    m = jnp.broadcast_to(attention_map, (B,) + attention_map.shape)
    q = m @ params["q_w"] + params["q_b"]
    kv = kv.reshape(B, seq_len, num_heads, 2 * hd).transpose(0, 2, 1, 3)
    q = q.reshape(B, seq_len, num_heads, hd).transpose(0, 2, 1, 3)
    k, v = kv[..., :hd], kv[..., hd:]
    attn = jnp.einsum("bhqd,bhkd->bhqk", q, k) / jnp.sqrt(jnp.float32(hd))

    pe = x @ params["pe_enc_w"] + params["pe_enc_b"]
    pe = ln(pe, params["pe_ln1_g"], params["pe_ln1_b"])
    pe = pe @ params["pe_lin_w"] + params["pe_lin_b"]
    pe = pe.reshape(B, seq_len, num_heads, p_enc_dim).transpose(0, 2, 1, 3)
    pe = ln(pe, params["pe_ln2_g"], params["pe_ln2_b"])
    pe = pe @ params["pe_dec_w"] + params["pe_dec_b"]

    attn = jax.nn.softmax(attn + pe, axis=-1)
    out = jnp.einsum("bhqk,bhkd->bhqd", attn, v)
    out = out.transpose(0, 2, 1, 3).reshape(B, seq_len, num_heads * hd)
    out = out @ params["out_w"] + params["out_b"]
    out = out + residual
    out = ln(out, params["ln_g"], params["ln_b"])
    out = jnp.maximum(out, 0.0)
    pol = out @ params["pol_w"] + params["pol_b"]
    return pol.reshape(B, seq_len * policy_dim)


if __name__ == "__main__":
    B, SEQ_LEN, INPUT_DIM, MODEL_DIM = 2, 8, 32, 32
    NUM_HEADS, POLICY_DIM, P_ENC_DIM, MAP_DIM = 4, 16, 16, 24

    key = jax.random.PRNGKey(0)
    kx, km, kp = jax.random.split(key, 3)
    x = jax.random.normal(kx, (B, SEQ_LEN, INPUT_DIM), dtype=jnp.float32)
    attention_map = jax.random.normal(km, (SEQ_LEN, MAP_DIM), dtype=jnp.float32)
    params = init_params(kp, seq_len=SEQ_LEN, input_dim=INPUT_DIM,
                         model_dim=MODEL_DIM, num_heads=NUM_HEADS,
                         policy_dim=POLICY_DIM, p_enc_dim=P_ENC_DIM,
                         map_dim=MAP_DIM)

    out = policy_head_forward(x, params, attention_map, seq_len=SEQ_LEN,
                              input_dim=INPUT_DIM, model_dim=MODEL_DIM,
                              num_heads=NUM_HEADS, policy_dim=POLICY_DIM,
                              p_enc_dim=P_ENC_DIM)
    out = jax.block_until_ready(out)

    ref = reference_forward(x, params, attention_map, seq_len=SEQ_LEN,
                            model_dim=MODEL_DIM, num_heads=NUM_HEADS,
                            policy_dim=POLICY_DIM, p_enc_dim=P_ENC_DIM)
    assert out.shape == (B, SEQ_LEN * POLICY_DIM), out.shape
    assert jnp.allclose(out, ref, atol=1e-4, rtol=1e-4), (out, ref)

    print("KERNEL_OK")
</pallas_src>

<mosaic_0001>
module attributes {stable_mosaic.version = 11 : i64} {
  func.func @_policy_head_kernel(%arg0: i32, %arg1: memref<1x8x32xf32, #tpu.memory_space<vmem>>, %arg2: memref<8x24xf32, #tpu.memory_space<vmem>>, %arg3: memref<32x64xf32, #tpu.memory_space<vmem>>, %arg4: memref<1x64xf32, #tpu.memory_space<vmem>>, %arg5: memref<24x32xf32, #tpu.memory_space<vmem>>, %arg6: memref<1x32xf32, #tpu.memory_space<vmem>>, %arg7: memref<32x16xf32, #tpu.memory_space<vmem>>, %arg8: memref<1x16xf32, #tpu.memory_space<vmem>>, %arg9: memref<1x16xf32, #tpu.memory_space<vmem>>, %arg10: memref<1x16xf32, #tpu.memory_space<vmem>>, %arg11: memref<16x64xf32, #tpu.memory_space<vmem>>, %arg12: memref<1x64xf32, #tpu.memory_space<vmem>>, %arg13: memref<1x16xf32, #tpu.memory_space<vmem>>, %arg14: memref<1x16xf32, #tpu.memory_space<vmem>>, %arg15: memref<16x8xf32, #tpu.memory_space<vmem>>, %arg16: memref<1x8xf32, #tpu.memory_space<vmem>>, %arg17: memref<32x32xf32, #tpu.memory_space<vmem>>, %arg18: memref<1x32xf32, #tpu.memory_space<vmem>>, %arg19: memref<1x32xf32, #tpu.memory_space<vmem>>, %arg20: memref<1x32xf32, #tpu.memory_space<vmem>>, %arg21: memref<32x16xf32, #tpu.memory_space<vmem>>, %arg22: memref<1x16xf32, #tpu.memory_space<vmem>>, %arg23: memref<1x8x16xf32, #tpu.memory_space<vmem>>) attributes {dimension_semantics = [#tpu.dimension_semantics<parallel>], iteration_bounds = array<i64: 2>, scalar_prefetch = 0 : i64, scratch_operands = 0 : i64, tpu.core_type = #tpu.core_type<tc>, window_params = [{transform_indices = @transform_0, window_bounds = array<i64: 1, 8, 32>}, {pipeline_mode = #tpu.pipeline_mode<synchronous>, transform_indices = @transform_1, window_bounds = array<i64: 8, 24>}, {pipeline_mode = #tpu.pipeline_mode<synchronous>, transform_indices = @transform_2, window_bounds = array<i64: 32, 64>}, {pipeline_mode = #tpu.pipeline_mode<synchronous>, transform_indices = @transform_3, window_bounds = array<i64: 1, 64>}, {pipeline_mode = #tpu.pipeline_mode<synchronous>, transform_indices = @transform_4, window_bounds = array<i64: 24, 32>}, {pipeline_mode = #tpu.pipeline_mode<synchronous>, transform_indices = @transform_5, window_bounds = array<i64: 1, 32>}, {pipeline_mode = #tpu.pipeline_mode<synchronous>, transform_indices = @transform_6, window_bounds = array<i64: 32, 16>}, {pipeline_mode = #tpu.pipeline_mode<synchronous>, transform_indices = @transform_7, window_bounds = array<i64: 1, 16>}, {pipeline_mode = #tpu.pipeline_mode<synchronous>, transform_indices = @transform_8, window_bounds = array<i64: 1, 16>}, {pipeline_mode = #tpu.pipeline_mode<synchronous>, transform_indices = @transform_9, window_bounds = array<i64: 1, 16>}, {pipeline_mode = #tpu.pipeline_mode<synchronous>, transform_indices = @transform_10, window_bounds = array<i64: 16, 64>}, {pipeline_mode = #tpu.pipeline_mode<synchronous>, transform_indices = @transform_11, window_bounds = array<i64: 1, 64>}, {pipeline_mode = #tpu.pipeline_mode<synchronous>, transform_indices = @transform_12, window_bounds = array<i64: 1, 16>}, {pipeline_mode = #tpu.pipeline_mode<synchronous>, transform_indices = @transform_13, window_bounds = array<i64: 1, 16>}, {pipeline_mode = #tpu.pipeline_mode<synchronous>, transform_indices = @transform_14, window_bounds = array<i64: 16, 8>}, {pipeline_mode = #tpu.pipeline_mode<synchronous>, transform_indices = @transform_15, window_bounds = array<i64: 1, 8>}, {pipeline_mode = #tpu.pipeline_mode<synchronous>, transform_indices = @transform_16, window_bounds = array<i64: 32, 32>}, {pipeline_mode = #tpu.pipeline_mode<synchronous>, transform_indices = @transform_17, window_bounds = array<i64: 1, 32>}, {pipeline_mode = #tpu.pipeline_mode<synchronous>, transform_indices = @transform_18, window_bounds = array<i64: 1, 32>}, {pipeline_mode = #tpu.pipeline_mode<synchronous>, transform_indices = @transform_19, window_bounds = array<i64: 1, 32>}, {pipeline_mode = #tpu.pipeline_mode<synchronous>, transform_indices = @transform_20, window_bounds = array<i64: 32, 16>}, {pipeline_mode = #tpu.pipeline_mode<synchronous>, transform_indices = @transform_21, window_bounds = array<i64: 1, 16>}, {transform_indices = @transform_22, window_bounds = array<i64: 1, 8, 16>}]} {
    %c0 = arith.constant 0 : index
    %c0_0 = arith.constant 0 : index
    %c0_1 = arith.constant 0 : index
    %0 = vector.load %arg1[%c0, %c0_0, %c0_1] : memref<1x8x32xf32, #tpu.memory_space<vmem>>, vector<1x8x32xf32>
    %1 = vector.shape_cast %0 : vector<1x8x32xf32> to vector<8x32xf32>
    %c0_2 = arith.constant 0 : index
    %c0_3 = arith.constant 0 : index
    %2 = vector.load %arg3[%c0_2, %c0_3] : memref<32x64xf32, #tpu.memory_space<vmem>>, vector<32x64xf32>
    %cst = arith.constant dense<0.000000e+00> : vector<8x64xf32>
    %3 = tpu.matmul %1, %2, %cst {dimension_numbers = #tpu.dot_dimension_numbers<[1], [0], [0], [1], [0, 0, 1, 1], [], []>} : vector<8x32xf32>, vector<32x64xf32>, vector<8x64xf32> -> vector<8x64xf32>
    %c0_4 = arith.constant 0 : index
    %c0_5 = arith.constant 0 : index
    %4 = vector.load %arg4[%c0_4, %c0_5] : memref<1x64xf32, #tpu.memory_space<vmem>>, vector<1x64xf32>
    %5 = vector.broadcast %4 : vector<1x64xf32> to vector<8x64xf32>
    %6 = arith.addf %3, %5 : vector<8x64xf32>
    %c0_6 = arith.constant 0 : index
    %c0_7 = arith.constant 0 : index
    %7 = vector.load %arg2[%c0_6, %c0_7] : memref<8x24xf32, #tpu.memory_space<vmem>>, vector<8x24xf32>
    %c0_8 = arith.constant 0 : index
    %c0_9 = arith.constant 0 : index
    %8 = vector.load %arg5[%c0_8, %c0_9] : memref<24x32xf32, #tpu.memory_space<vmem>>, vector<24x32xf32>
    %cst_10 = arith.constant dense<0.000000e+00> : vector<8x32xf32>
    %9 = tpu.matmul %7, %8, %cst_10 {dimension_numbers = #tpu.dot_dimension_numbers<[1], [0], [0], [1], [0, 0, 1, 1], [], []>} : vector<8x24xf32>, vector<24x32xf32>, vector<8x32xf32> -> vector<8x32xf32>
    %c0_11 = arith.constant 0 : index
    %c0_12 = arith.constant 0 : index
    %10 = vector.load %arg6[%c0_11, %c0_12] : memref<1x32xf32, #tpu.memory_space<vmem>>, vector<1x32xf32>
    %11 = vector.broadcast %10 : vector<1x32xf32> to vector<8x32xf32>
    %12 = arith.addf %9, %11 : vector<8x32xf32>
    %c0_13 = arith.constant 0 : index
    %c0_14 = arith.constant 0 : index
    %13 = vector.load %arg7[%c0_13, %c0_14] : memref<32x16xf32, #tpu.memory_space<vmem>>, vector<32x16xf32>
    %cst_15 = arith.constant dense<0.000000e+00> : vector<8x16xf32>
    %14 = tpu.matmul %1, %13, %cst_15 {dimension_numbers = #tpu.dot_dimension_numbers<[1], [0], [0], [1], [0, 0, 1, 1], [], []>} : vector<8x32xf32>, vector<32x16xf32>, vector<8x16xf32> -> vector<8x16xf32>
    %c0_16 = arith.constant 0 : index
    %c0_17 = arith.constant 0 : index
    %15 = vector.load %arg8[%c0_16, %c0_17] : memref<1x16xf32, #tpu.memory_space<vmem>>, vector<1x16xf32>
    %16 = vector.broadcast %15 : vector<1x16xf32> to vector<8x16xf32>
    %17 = arith.addf %14, %16 : vector<8x16xf32>
    %c0_18 = arith.constant 0 : index
    %c0_19 = arith.constant 0 : index
    %18 = vector.load %arg9[%c0_18, %c0_19] : memref<1x16xf32, #tpu.memory_space<vmem>>, vector<1x16xf32>
    %c0_20 = arith.constant 0 : index
    %c0_21 = arith.constant 0 : index
    %19 = vector.load %arg10[%c0_20, %c0_21] : memref<1x16xf32, #tpu.memory_space<vmem>>, vector<1x16xf32>
    %cst_22 = arith.constant dense<0.000000e+00> : vector<8xf32>
    %20 = vector.multi_reduction <add>, %17, %cst_22 [1] : vector<8x16xf32> to vector<8xf32>
    %21 = vector.shape_cast %20 : vector<8xf32> to vector<8x1xf32>
    %cst_23 = arith.constant 1.600000e+01 : f32
    %22 = vector.broadcast %cst_23 : f32 to vector<8x1xf32>
    %23 = arith.divf %21, %22 : vector<8x1xf32>
    %24 = vector.broadcast %23 : vector<8x1xf32> to vector<8x16xf32>
    %25 = arith.subf %17, %24 : vector<8x16xf32>
    %26 = arith.mulf %25, %25 : vector<8x16xf32>
    %cst_24 = arith.constant dense<0.000000e+00> : vector<8xf32>
    %27 = vector.multi_reduction <add>, %26, %cst_24 [1] : vector<8x16xf32> to vector<8xf32>
    %28 = vector.shape_cast %27 : vector<8xf32> to vector<8x1xf32>
    %cst_25 = arith.constant 1.600000e+01 : f32
    %29 = vector.broadcast %cst_25 : f32 to vector<8x1xf32>
    %30 = arith.divf %28, %29 : vector<8x1xf32>
    %31 = vector.broadcast %23 : vector<8x1xf32> to vector<8x16xf32>
    %32 = arith.subf %17, %31 : vector<8x16xf32>
    %cst_26 = arith.constant 9.99999974E-6 : f32
    %33 = vector.broadcast %cst_26 : f32 to vector<8x1xf32>
    %34 = arith.addf %30, %33 : vector<8x1xf32>
    %35 = math.rsqrt %34 : vector<8x1xf32>
    %36 = vector.broadcast %35 : vector<8x1xf32> to vector<8x16xf32>
    %37 = arith.mulf %32, %36 : vector<8x16xf32>
    %38 = vector.broadcast %18 : vector<1x16xf32> to vector<8x16xf32>
    %39 = arith.mulf %37, %38 : vector<8x16xf32>
    %40 = vector.broadcast %19 : vector<1x16xf32> to vector<8x16xf32>
    %41 = arith.addf %39, %40 : vector<8x16xf32>
    %c0_27 = arith.constant 0 : index
    %c0_28 = arith.constant 0 : index
    %42 = vector.load %arg11[%c0_27, %c0_28] : memref<16x64xf32, #tpu.memory_space<vmem>>, vector<16x64xf32>
    %cst_29 = arith.constant dense<0.000000e+00> : vector<8x64xf32>
    %43 = tpu.matmul %41, %42, %cst_29 {dimension_numbers = #tpu.dot_dimension_numbers<[1], [0], [0], [1], [0, 0, 1, 1], [], []>} : vector<8x16xf32>, vector<16x64xf32>, vector<8x64xf32> -> vector<8x64xf32>
    %c0_30 = arith.constant 0 : index
    %c0_31 = arith.constant 0 : index
    %44 = vector.load %arg12[%c0_30, %c0_31] : memref<1x64xf32, #tpu.memory_space<vmem>>, vector<1x64xf32>
    %45 = vector.broadcast %44 : vector<1x64xf32> to vector<8x64xf32>
    %46 = arith.addf %43, %45 : vector<8x64xf32>
    %c0_32 = arith.constant 0 : index
    %c0_33 = arith.constant 0 : index
    %47 = vector.load %arg17[%c0_32, %c0_33] : memref<32x32xf32, #tpu.memory_space<vmem>>, vector<32x32xf32>
    %cst_34 = arith.constant 0.000000e+00 : f32
    %48 = vector.broadcast %cst_34 : f32 to vector<8x32xf32>
    %49 = vector.extract_strided_slice %6 {offsets = [0, 0], sizes = [8, 8], strides = [1, 1]} : vector<8x64xf32> to vector<8x8xf32>
    %50 = vector.extract_strided_slice %6 {offsets = [0, 8], sizes = [8, 8], strides = [1, 1]} : vector<8x64xf32> to vector<8x8xf32>
    %51 = vector.extract_strided_slice %12 {offsets = [0, 0], sizes = [8, 8], strides = [1, 1]} : vector<8x32xf32> to vector<8x8xf32>
    %cst_35 = arith.constant dense<0.000000e+00> : vector<8x8xf32>
    %52 = tpu.matmul %51, %49, %cst_35 {dimension_numbers = #tpu.dot_dimension_numbers<[1], [1], [0], [0], [0, 0, 1, 0], [], []>} : vector<8x8xf32>, vector<8x8xf32>, vector<8x8xf32> -> vector<8x8xf32>
    %cst_36 = arith.constant 0.353553385 : f32
    %53 = vector.broadcast %cst_36 : f32 to vector<8x8xf32>
    %54 = arith.mulf %52, %53 : vector<8x8xf32>
    %55 = vector.extract_strided_slice %46 {offsets = [0, 0], sizes = [8, 16], strides = [1, 1]} : vector<8x64xf32> to vector<8x16xf32>
    %c0_37 = arith.constant 0 : index
    %c0_38 = arith.constant 0 : index
    %56 = vector.load %arg13[%c0_37, %c0_38] : memref<1x16xf32, #tpu.memory_space<vmem>>, vector<1x16xf32>
    %c0_39 = arith.constant 0 : index
    %c0_40 = arith.constant 0 : index
    %57 = vector.load %arg14[%c0_39, %c0_40] : memref<1x16xf32, #tpu.memory_space<vmem>>, vector<1x16xf32>
    %cst_41 = arith.constant dense<0.000000e+00> : vector<8xf32>
    %58 = vector.multi_reduction <add>, %55, %cst_41 [1] : vector<8x16xf32> to vector<8xf32>
    %59 = vector.shape_cast %58 : vector<8xf32> to vector<8x1xf32>
    %cst_42 = arith.constant 1.600000e+01 : f32
    %60 = vector.broadcast %cst_42 : f32 to vector<8x1xf32>
    %61 = arith.divf %59, %60 : vector<8x1xf32>
    %62 = vector.broadcast %61 : vector<8x1xf32> to vector<8x16xf32>
    %63 = arith.subf %55, %62 : vector<8x16xf32>
    %64 = arith.mulf %63, %63 : vector<8x16xf32>
    %cst_43 = arith.constant dense<0.000000e+00> : vector<8xf32>
    %65 = vector.multi_reduction <add>, %64, %cst_43 [1] : vector<8x16xf32> to vector<8xf32>
    %66 = vector.shape_cast %65 : vector<8xf32> to vector<8x1xf32>
    %cst_44 = arith.constant 1.600000e+01 : f32
    %67 = vector.broadcast %cst_44 : f32 to vector<8x1xf32>
    %68 = arith.divf %66, %67 : vector<8x1xf32>
    %69 = vector.broadcast %61 : vector<8x1xf32> to vector<8x16xf32>
    %70 = arith.subf %55, %69 : vector<8x16xf32>
    %cst_45 = arith.constant 9.99999974E-6 : f32
    %71 = vector.broadcast %cst_45 : f32 to vector<8x1xf32>
    %72 = arith.addf %68, %71 : vector<8x1xf32>
    %73 = math.rsqrt %72 : vector<8x1xf32>
    %74 = vector.broadcast %73 : vector<8x1xf32> to vector<8x16xf32>
    %75 = arith.mulf %70, %74 : vector<8x16xf32>
    %76 = vector.broadcast %56 : vector<1x16xf32> to vector<8x16xf32>
    %77 = arith.mulf %75, %76 : vector<8x16xf32>
    %78 = vector.broadcast %57 : vector<1x16xf32> to vector<8x16xf32>
    %79 = arith.addf %77, %78 : vector<8x16xf32>
    %c0_46 = arith.constant 0 : index
    %c0_47 = arith.constant 0 : index
    %80 = vector.load %arg15[%c0_46, %c0_47] : memref<16x8xf32, #tpu.memory_space<vmem>>, vector<16x8xf32>
    %cst_48 = arith.constant dense<0.000000e+00> : vector<8x8xf32>
    %81 = tpu.matmul %79, %80, %cst_48 {dimension_numbers = #tpu.dot_dimension_numbers<[1], [0], [0], [1], [0, 0, 1, 1], [], []>} : vector<8x16xf32>, vector<16x8xf32>, vector<8x8xf32> -> vector<8x8xf32>
    %c0_49 = arith.constant 0 : index
    %c0_50 = arith.constant 0 : index
    %82 = vector.load %arg16[%c0_49, %c0_50] : memref<1x8xf32, #tpu.memory_space<vmem>>, vector<1x8xf32>
    %83 = vector.broadcast %82 : vector<1x8xf32> to vector<8x8xf32>
    %84 = arith.addf %81, %83 : vector<8x8xf32>
    %85 = arith.addf %54, %84 : vector<8x8xf32>
    %cst_51 = arith.constant dense<0xFF800000> : vector<8xf32>
    %86 = vector.multi_reduction <maximumf>, %85, %cst_51 [1] : vector<8x8xf32> to vector<8xf32>
    %87 = vector.shape_cast %86 : vector<8xf32> to vector<8x1xf32>
    %88 = vector.broadcast %87 : vector<8x1xf32> to vector<8x8xf32>
    %89 = arith.subf %85, %88 : vector<8x8xf32>
    %90 = math.exp %89 : vector<8x8xf32>
    %cst_52 = arith.constant dense<0.000000e+00> : vector<8xf32>
    %91 = vector.multi_reduction <add>, %90, %cst_52 [1] : vector<8x8xf32> to vector<8xf32>
    %92 = vector.shape_cast %91 : vector<8xf32> to vector<8x1xf32>
    %93 = vector.broadcast %92 : vector<8x1xf32> to vector<8x8xf32>
    %94 = arith.divf %90, %93 : vector<8x8xf32>
    %cst_53 = arith.constant dense<0.000000e+00> : vector<8x8xf32>
    %95 = tpu.matmul %94, %50, %cst_53 {dimension_numbers = #tpu.dot_dimension_numbers<[1], [0], [0], [1], [0, 0, 1, 1], [], []>} : vector<8x8xf32>, vector<8x8xf32>, vector<8x8xf32> -> vector<8x8xf32>
    %96 = vector.extract_strided_slice %47 {offsets = [0, 0], sizes = [8, 32], strides = [1, 1]} : vector<32x32xf32> to vector<8x32xf32>
    %cst_54 = arith.constant dense<0.000000e+00> : vector<8x32xf32>
    %97 = tpu.matmul %95, %96, %cst_54 {dimension_numbers = #tpu.dot_dimension_numbers<[1], [0], [0], [1], [0, 0, 1, 1], [], []>} : vector<8x8xf32>, vector<8x32xf32>, vector<8x32xf32> -> vector<8x32xf32>
    %98 = arith.addf %48, %97 : vector<8x32xf32>
    %99 = vector.extract_strided_slice %6 {offsets = [0, 16], sizes = [8, 8], strides = [1, 1]} : vector<8x64xf32> to vector<8x8xf32>
    %100 = vector.extract_strided_slice %6 {offsets = [0, 24], sizes = [8, 8], strides = [1, 1]} : vector<8x64xf32> to vector<8x8xf32>
    %101 = vector.extract_strided_slice %12 {offsets = [0, 8], sizes = [8, 8], strides = [1, 1]} : vector<8x32xf32> to vector<8x8xf32>
    %cst_55 = arith.constant dense<0.000000e+00> : vector<8x8xf32>
    %102 = tpu.matmul %101, %99, %cst_55 {dimension_numbers = #tpu.dot_dimension_numbers<[1], [1], [0], [0], [0, 0, 1, 0], [], []>} : vector<8x8xf32>, vector<8x8xf32>, vector<8x8xf32> -> vector<8x8xf32>
    %cst_56 = arith.constant 0.353553385 : f32
    %103 = vector.broadcast %cst_56 : f32 to vector<8x8xf32>
    %104 = arith.mulf %102, %103 : vector<8x8xf32>
    %105 = vector.extract_strided_slice %46 {offsets = [0, 16], sizes = [8, 16], strides = [1, 1]} : vector<8x64xf32> to vector<8x16xf32>
    %c0_57 = arith.constant 0 : index
    %c0_58 = arith.constant 0 : index
    %106 = vector.load %arg13[%c0_57, %c0_58] : memref<1x16xf32, #tpu.memory_space<vmem>>, vector<1x16xf32>
    %c0_59 = arith.constant 0 : index
    %c0_60 = arith.constant 0 : index
    %107 = vector.load %arg14[%c0_59, %c0_60] : memref<1x16xf32, #tpu.memory_space<vmem>>, vector<1x16xf32>
    %cst_61 = arith.constant dense<0.000000e+00> : vector<8xf32>
    %108 = vector.multi_reduction <add>, %105, %cst_61 [1] : vector<8x16xf32> to vector<8xf32>
    %109 = vector.shape_cast %108 : vector<8xf32> to vector<8x1xf32>
    %cst_62 = arith.constant 1.600000e+01 : f32
    %110 = vector.broadcast %cst_62 : f32 to vector<8x1xf32>
    %111 = arith.divf %109, %110 : vector<8x1xf32>
    %112 = vector.broadcast %111 : vector<8x1xf32> to vector<8x16xf32>
    %113 = arith.subf %105, %112 : vector<8x16xf32>
    %114 = arith.mulf %113, %113 : vector<8x16xf32>
    %cst_63 = arith.constant dense<0.000000e+00> : vector<8xf32>
    %115 = vector.multi_reduction <add>, %114, %cst_63 [1] : vector<8x16xf32> to vector<8xf32>
    %116 = vector.shape_cast %115 : vector<8xf32> to vector<8x1xf32>
    %cst_64 = arith.constant 1.600000e+01 : f32
    %117 = vector.broadcast %cst_64 : f32 to vector<8x1xf32>
    %118 = arith.divf %116, %117 : vector<8x1xf32>
    %119 = vector.broadcast %111 : vector<8x1xf32> to vector<8x16xf32>
    %120 = arith.subf %105, %119 : vector<8x16xf32>
    %cst_65 = arith.constant 9.99999974E-6 : f32
    %121 = vector.broadcast %cst_65 : f32 to vector<8x1xf32>
    %122 = arith.addf %118, %121 : vector<8x1xf32>
    %123 = math.rsqrt %122 : vector<8x1xf32>
    %124 = vector.broadcast %123 : vector<8x1xf32> to vector<8x16xf32>
    %125 = arith.mulf %120, %124 : vector<8x16xf32>
    %126 = vector.broadcast %106 : vector<1x16xf32> to vector<8x16xf32>
    %127 = arith.mulf %125, %126 : vector<8x16xf32>
    %128 = vector.broadcast %107 : vector<1x16xf32> to vector<8x16xf32>
    %129 = arith.addf %127, %128 : vector<8x16xf32>
    %c0_66 = arith.constant 0 : index
    %c0_67 = arith.constant 0 : index
    %130 = vector.load %arg15[%c0_66, %c0_67] : memref<16x8xf32, #tpu.memory_space<vmem>>, vector<16x8xf32>
    %cst_68 = arith.constant dense<0.000000e+00> : vector<8x8xf32>
    %131 = tpu.matmul %129, %130, %cst_68 {dimension_numbers = #tpu.dot_dimension_numbers<[1], [0], [0], [1], [0, 0, 1, 1], [], []>} : vector<8x16xf32>, vector<16x8xf32>, vector<8x8xf32> -> vector<8x8xf32>
    %c0_69 = arith.constant 0 : index
    %c0_70 = arith.constant 0 : index
    %132 = vector.load %arg16[%c0_69, %c0_70] : memref<1x8xf32, #tpu.memory_space<vmem>>, vector<1x8xf32>
    %133 = vector.broadcast %132 : vector<1x8xf32> to vector<8x8xf32>
    %134 = arith.addf %131, %133 : vector<8x8xf32>
    %135 = arith.addf %104, %134 : vector<8x8xf32>
    %cst_71 = arith.constant dense<0xFF800000> : vector<8xf32>
    %136 = vector.multi_reduction <maximumf>, %135, %cst_71 [1] : vector<8x8xf32> to vector<8xf32>
    %137 = vector.shape_cast %136 : vector<8xf32> to vector<8x1xf32>
    %138 = vector.broadcast %137 : vector<8x1xf32> to vector<8x8xf32>
    %139 = arith.subf %135, %138 : vector<8x8xf32>
    %140 = math.exp %139 : vector<8x8xf32>
    %cst_72 = arith.constant dense<0.000000e+00> : vector<8xf32>
    %141 = vector.multi_reduction <add>, %140, %cst_72 [1] : vector<8x8xf32> to vector<8xf32>
    %142 = vector.shape_cast %141 : vector<8xf32> to vector<8x1xf32>
    %143 = vector.broadcast %142 : vector<8x1xf32> to vector<8x8xf32>
    %144 = arith.divf %140, %143 : vector<8x8xf32>
    %cst_73 = arith.constant dense<0.000000e+00> : vector<8x8xf32>
    %145 = tpu.matmul %144, %100, %cst_73 {dimension_numbers = #tpu.dot_dimension_numbers<[1], [0], [0], [1], [0, 0, 1, 1], [], []>} : vector<8x8xf32>, vector<8x8xf32>, vector<8x8xf32> -> vector<8x8xf32>
    %146 = vector.extract_strided_slice %47 {offsets = [8, 0], sizes = [8, 32], strides = [1, 1]} : vector<32x32xf32> to vector<8x32xf32>
    %cst_74 = arith.constant dense<0.000000e+00> : vector<8x32xf32>
    %147 = tpu.matmul %145, %146, %cst_74 {dimension_numbers = #tpu.dot_dimension_numbers<[1], [0], [0], [1], [0, 0, 1, 1], [], []>} : vector<8x8xf32>, vector<8x32xf32>, vector<8x32xf32> -> vector<8x32xf32>
    %148 = arith.addf %98, %147 : vector<8x32xf32>
    %149 = vector.extract_strided_slice %6 {offsets = [0, 32], sizes = [8, 8], strides = [1, 1]} : vector<8x64xf32> to vector<8x8xf32>
    %150 = vector.extract_strided_slice %6 {offsets = [0, 40], sizes = [8, 8], strides = [1, 1]} : vector<8x64xf32> to vector<8x8xf32>
    %151 = vector.extract_strided_slice %12 {offsets = [0, 16], sizes = [8, 8], strides = [1, 1]} : vector<8x32xf32> to vector<8x8xf32>
    %cst_75 = arith.constant dense<0.000000e+00> : vector<8x8xf32>
    %152 = tpu.matmul %151, %149, %cst_75 {dimension_numbers = #tpu.dot_dimension_numbers<[1], [1], [0], [0], [0, 0, 1, 0], [], []>} : vector<8x8xf32>, vector<8x8xf32>, vector<8x8xf32> -> vector<8x8xf32>
    %cst_76 = arith.constant 0.353553385 : f32
    %153 = vector.broadcast %cst_76 : f32 to vector<8x8xf32>
    %154 = arith.mulf %152, %153 : vector<8x8xf32>
    %155 = vector.extract_strided_slice %46 {offsets = [0, 32], sizes = [8, 16], strides = [1, 1]} : vector<8x64xf32> to vector<8x16xf32>
    %c0_77 = arith.constant 0 : index
    %c0_78 = arith.constant 0 : index
    %156 = vector.load %arg13[%c0_77, %c0_78] : memref<1x16xf32, #tpu.memory_space<vmem>>, vector<1x16xf32>
    %c0_79 = arith.constant 0 : index
    %c0_80 = arith.constant 0 : index
    %157 = vector.load %arg14[%c0_79, %c0_80] : memref<1x16xf32, #tpu.memory_space<vmem>>, vector<1x16xf32>
    %cst_81 = arith.constant dense<0.000000e+00> : vector<8xf32>
    %158 = vector.multi_reduction <add>, %155, %cst_81 [1] : vector<8x16xf32> to vector<8xf32>
    %159 = vector.shape_cast %158 : vector<8xf32> to vector<8x1xf32>
    %cst_82 = arith.constant 1.600000e+01 : f32
    %160 = vector.broadcast %cst_82 : f32 to vector<8x1xf32>
    %161 = arith.divf %159, %160 : vector<8x1xf32>
    %162 = vector.broadcast %161 : vector<8x1xf32> to vector<8x16xf32>
    %163 = arith.subf %155, %162 : vector<8x16xf32>
    %164 = arith.mulf %163, %163 : vector<8x16xf32>
    %cst_83 = arith.constant dense<0.000000e+00> : vector<8xf32>
    %165 = vector.multi_reduction <add>, %164, %cst_83 [1] : vector<8x16xf32> to vector<8xf32>
    %166 = vector.shape_cast %165 : vector<8xf32> to vector<8x1xf32>
    %cst_84 = arith.constant 1.600000e+01 : f32
    %167 = vector.broadcast %cst_84 : f32 to vector<8x1xf32>
    %168 = arith.divf %166, %167 : vector<8x1xf32>
    %169 = vector.broadcast %161 : vector<8x1xf32> to vector<8x16xf32>
    %170 = arith.subf %155, %169 : vector<8x16xf32>
    %cst_85 = arith.constant 9.99999974E-6 : f32
    %171 = vector.broadcast %cst_85 : f32 to vector<8x1xf32>
    %172 = arith.addf %168, %171 : vector<8x1xf32>
    %173 = math.rsqrt %172 : vector<8x1xf32>
    %174 = vector.broadcast %173 : vector<8x1xf32> to vector<8x16xf32>
    %175 = arith.mulf %170, %174 : vector<8x16xf32>
    %176 = vector.broadcast %156 : vector<1x16xf32> to vector<8x16xf32>
    %177 = arith.mulf %175, %176 : vector<8x16xf32>
    %178 = vector.broadcast %157 : vector<1x16xf32> to vector<8x16xf32>
    %179 = arith.addf %177, %178 : vector<8x16xf32>
    %c0_86 = arith.constant 0 : index
    %c0_87 = arith.constant 0 : index
    %180 = vector.load %arg15[%c0_86, %c0_87] : memref<16x8xf32, #tpu.memory_space<vmem>>, vector<16x8xf32>
    %cst_88 = arith.constant dense<0.000000e+00> : vector<8x8xf32>
    %181 = tpu.matmul %179, %180, %cst_88 {dimension_numbers = #tpu.dot_dimension_numbers<[1], [0], [0], [1], [0, 0, 1, 1], [], []>} : vector<8x16xf32>, vector<16x8xf32>, vector<8x8xf32> -> vector<8x8xf32>
    %c0_89 = arith.constant 0 : index
    %c0_90 = arith.constant 0 : index
    %182 = vector.load %arg16[%c0_89, %c0_90] : memref<1x8xf32, #tpu.memory_space<vmem>>, vector<1x8xf32>
    %183 = vector.broadcast %182 : vector<1x8xf32> to vector<8x8xf32>
    %184 = arith.addf %181, %183 : vector<8x8xf32>
    %185 = arith.addf %154, %184 : vector<8x8xf32>
    %cst_91 = arith.constant dense<0xFF800000> : vector<8xf32>
    %186 = vector.multi_reduction <maximumf>, %185, %cst_91 [1] : vector<8x8xf32> to vector<8xf32>
    %187 = vector.shape_cast %186 : vector<8xf32> to vector<8x1xf32>
    %188 = vector.broadcast %187 : vector<8x1xf32> to vector<8x8xf32>
    %189 = arith.subf %185, %188 : vector<8x8xf32>
    %190 = math.exp %189 : vector<8x8xf32>
    %cst_92 = arith.constant dense<0.000000e+00> : vector<8xf32>
    %191 = vector.multi_reduction <add>, %190, %cst_92 [1] : vector<8x8xf32> to vector<8xf32>
    %192 = vector.shape_cast %191 : vector<8xf32> to vector<8x1xf32>
    %193 = vector.broadcast %192 : vector<8x1xf32> to vector<8x8xf32>
    %194 = arith.divf %190, %193 : vector<8x8xf32>
    %cst_93 = arith.constant dense<0.000000e+00> : vector<8x8xf32>
    %195 = tpu.matmul %194, %150, %cst_93 {dimension_numbers = #tpu.dot_dimension_numbers<[1], [0], [0], [1], [0, 0, 1, 1], [], []>} : vector<8x8xf32>, vector<8x8xf32>, vector<8x8xf32> -> vector<8x8xf32>
    %196 = vector.extract_strided_slice %47 {offsets = [16, 0], sizes = [8, 32], strides = [1, 1]} : vector<32x32xf32> to vector<8x32xf32>
    %cst_94 = arith.constant dense<0.000000e+00> : vector<8x32xf32>
    %197 = tpu.matmul %195, %196, %cst_94 {dimension_numbers = #tpu.dot_dimension_numbers<[1], [0], [0], [1], [0, 0, 1, 1], [], []>} : vector<8x8xf32>, vector<8x32xf32>, vector<8x32xf32> -> vector<8x32xf32>
    %198 = arith.addf %148, %197 : vector<8x32xf32>
    %199 = vector.extract_strided_slice %6 {offsets = [0, 48], sizes = [8, 8], strides = [1, 1]} : vector<8x64xf32> to vector<8x8xf32>
    %200 = vector.extract_strided_slice %6 {offsets = [0, 56], sizes = [8, 8], strides = [1, 1]} : vector<8x64xf32> to vector<8x8xf32>
    %201 = vector.extract_strided_slice %12 {offsets = [0, 24], sizes = [8, 8], strides = [1, 1]} : vector<8x32xf32> to vector<8x8xf32>
    %cst_95 = arith.constant dense<0.000000e+00> : vector<8x8xf32>
    %202 = tpu.matmul %201, %199, %cst_95 {dimension_numbers = #tpu.dot_dimension_numbers<[1], [1], [0], [0], [0, 0, 1, 0], [], []>} : vector<8x8xf32>, vector<8x8xf32>, vector<8x8xf32> -> vector<8x8xf32>
    %cst_96 = arith.constant 0.353553385 : f32
    %203 = vector.broadcast %cst_96 : f32 to vector<8x8xf32>
    %204 = arith.mulf %202, %203 : vector<8x8xf32>
    %205 = vector.extract_strided_slice %46 {offsets = [0, 48], sizes = [8, 16], strides = [1, 1]} : vector<8x64xf32> to vector<8x16xf32>
    %c0_97 = arith.constant 0 : index
    %c0_98 = arith.constant 0 : index
    %206 = vector.load %arg13[%c0_97, %c0_98] : memref<1x16xf32, #tpu.memory_space<vmem>>, vector<1x16xf32>
    %c0_99 = arith.constant 0 : index
    %c0_100 = arith.constant 0 : index
    %207 = vector.load %arg14[%c0_99, %c0_100] : memref<1x16xf32, #tpu.memory_space<vmem>>, vector<1x16xf32>
    %cst_101 = arith.constant dense<0.000000e+00> : vector<8xf32>
    %208 = vector.multi_reduction <add>, %205, %cst_101 [1] : vector<8x16xf32> to vector<8xf32>
    %209 = vector.shape_cast %208 : vector<8xf32> to vector<8x1xf32>
    %cst_102 = arith.constant 1.600000e+01 : f32
    %210 = vector.broadcast %cst_102 : f32 to vector<8x1xf32>
    %211 = arith.divf %209, %210 : vector<8x1xf32>
    %212 = vector.broadcast %211 : vector<8x1xf32> to vector<8x16xf32>
    %213 = arith.subf %205, %212 : vector<8x16xf32>
    %214 = arith.mulf %213, %213 : vector<8x16xf32>
    %cst_103 = arith.constant dense<0.000000e+00> : vector<8xf32>
    %215 = vector.multi_reduction <add>, %214, %cst_103 [1] : vector<8x16xf32> to vector<8xf32>
    %216 = vector.shape_cast %215 : vector<8xf32> to vector<8x1xf32>
    %cst_104 = arith.constant 1.600000e+01 : f32
    %217 = vector.broadcast %cst_104 : f32 to vector<8x1xf32>
    %218 = arith.divf %216, %217 : vector<8x1xf32>
    %219 = vector.broadcast %211 : vector<8x1xf32> to vector<8x16xf32>
    %220 = arith.subf %205, %219 : vector<8x16xf32>
    %cst_105 = arith.constant 9.99999974E-6 : f32
    %221 = vector.broadcast %cst_105 : f32 to vector<8x1xf32>
    %222 = arith.addf %218, %221 : vector<8x1xf32>
    %223 = math.rsqrt %222 : vector<8x1xf32>
    %224 = vector.broadcast %223 : vector<8x1xf32> to vector<8x16xf32>
    %225 = arith.mulf %220, %224 : vector<8x16xf32>
    %226 = vector.broadcast %206 : vector<1x16xf32> to vector<8x16xf32>
    %227 = arith.mulf %225, %226 : vector<8x16xf32>
    %228 = vector.broadcast %207 : vector<1x16xf32> to vector<8x16xf32>
    %229 = arith.addf %227, %228 : vector<8x16xf32>
    %c0_106 = arith.constant 0 : index
    %c0_107 = arith.constant 0 : index
    %230 = vector.load %arg15[%c0_106, %c0_107] : memref<16x8xf32, #tpu.memory_space<vmem>>, vector<16x8xf32>
    %cst_108 = arith.constant dense<0.000000e+00> : vector<8x8xf32>
    %231 = tpu.matmul %229, %230, %cst_108 {dimension_numbers = #tpu.dot_dimension_numbers<[1], [0], [0], [1], [0, 0, 1, 1], [], []>} : vector<8x16xf32>, vector<16x8xf32>, vector<8x8xf32> -> vector<8x8xf32>
    %c0_109 = arith.constant 0 : index
    %c0_110 = arith.constant 0 : index
    %232 = vector.load %arg16[%c0_109, %c0_110] : memref<1x8xf32, #tpu.memory_space<vmem>>, vector<1x8xf32>
    %233 = vector.broadcast %232 : vector<1x8xf32> to vector<8x8xf32>
    %234 = arith.addf %231, %233 : vector<8x8xf32>
    %235 = arith.addf %204, %234 : vector<8x8xf32>
    %cst_111 = arith.constant dense<0xFF800000> : vector<8xf32>
    %236 = vector.multi_reduction <maximumf>, %235, %cst_111 [1] : vector<8x8xf32> to vector<8xf32>
    %237 = vector.shape_cast %236 : vector<8xf32> to vector<8x1xf32>
    %238 = vector.broadcast %237 : vector<8x1xf32> to vector<8x8xf32>
    %239 = arith.subf %235, %238 : vector<8x8xf32>
    %240 = math.exp %239 : vector<8x8xf32>
    %cst_112 = arith.constant dense<0.000000e+00> : vector<8xf32>
    %241 = vector.multi_reduction <add>, %240, %cst_112 [1] : vector<8x8xf32> to vector<8xf32>
    %242 = vector.shape_cast %241 : vector<8xf32> to vector<8x1xf32>
    %243 = vector.broadcast %242 : vector<8x1xf32> to vector<8x8xf32>
    %244 = arith.divf %240, %243 : vector<8x8xf32>
    %cst_113 = arith.constant dense<0.000000e+00> : vector<8x8xf32>
    %245 = tpu.matmul %244, %200, %cst_113 {dimension_numbers = #tpu.dot_dimension_numbers<[1], [0], [0], [1], [0, 0, 1, 1], [], []>} : vector<8x8xf32>, vector<8x8xf32>, vector<8x8xf32> -> vector<8x8xf32>
    %246 = vector.extract_strided_slice %47 {offsets = [24, 0], sizes = [8, 32], strides = [1, 1]} : vector<32x32xf32> to vector<8x32xf32>
    %cst_114 = arith.constant dense<0.000000e+00> : vector<8x32xf32>
    %247 = tpu.matmul %245, %246, %cst_114 {dimension_numbers = #tpu.dot_dimension_numbers<[1], [0], [0], [1], [0, 0, 1, 1], [], []>} : vector<8x8xf32>, vector<8x32xf32>, vector<8x32xf32> -> vector<8x32xf32>
    %248 = arith.addf %198, %247 : vector<8x32xf32>
    %c0_115 = arith.constant 0 : index
    %c0_116 = arith.constant 0 : index
    %249 = vector.load %arg18[%c0_115, %c0_116] : memref<1x32xf32, #tpu.memory_space<vmem>>, vector<1x32xf32>
    %250 = vector.broadcast %249 : vector<1x32xf32> to vector<8x32xf32>
    %251 = arith.addf %248, %250 : vector<8x32xf32>
    %252 = arith.addf %251, %1 : vector<8x32xf32>
    %c0_117 = arith.constant 0 : index
    %c0_118 = arith.constant 0 : index
    %253 = vector.load %arg19[%c0_117, %c0_118] : memref<1x32xf32, #tpu.memory_space<vmem>>, vector<1x32xf32>
    %c0_119 = arith.constant 0 : index
    %c0_120 = arith.constant 0 : index
    %254 = vector.load %arg20[%c0_119, %c0_120] : memref<1x32xf32, #tpu.memory_space<vmem>>, vector<1x32xf32>
    %cst_121 = arith.constant dense<0.000000e+00> : vector<8xf32>
    %255 = vector.multi_reduction <add>, %252, %cst_121 [1] : vector<8x32xf32> to vector<8xf32>
    %256 = vector.shape_cast %255 : vector<8xf32> to vector<8x1xf32>
    %cst_122 = arith.constant 3.200000e+01 : f32
    %257 = vector.broadcast %cst_122 : f32 to vector<8x1xf32>
    %258 = arith.divf %256, %257 : vector<8x1xf32>
    %259 = vector.broadcast %258 : vector<8x1xf32> to vector<8x32xf32>
    %260 = arith.subf %252, %259 : vector<8x32xf32>
    %261 = arith.mulf %260, %260 : vector<8x32xf32>
    %cst_123 = arith.constant dense<0.000000e+00> : vector<8xf32>
    %262 = vector.multi_reduction <add>, %261, %cst_123 [1] : vector<8x32xf32> to vector<8xf32>
    %263 = vector.shape_cast %262 : vector<8xf32> to vector<8x1xf32>
    %cst_124 = arith.constant 3.200000e+01 : f32
    %264 = vector.broadcast %cst_124 : f32 to vector<8x1xf32>
    %265 = arith.divf %263, %264 : vector<8x1xf32>
    %266 = vector.broadcast %258 : vector<8x1xf32> to vector<8x32xf32>
    %267 = arith.subf %252, %266 : vector<8x32xf32>
    %cst_125 = arith.constant 9.99999974E-6 : f32
    %268 = vector.broadcast %cst_125 : f32 to vector<8x1xf32>
    %269 = arith.addf %265, %268 : vector<8x1xf32>
    %270 = math.rsqrt %269 : vector<8x1xf32>
    %271 = vector.broadcast %270 : vector<8x1xf32> to vector<8x32xf32>
    %272 = arith.mulf %267, %271 : vector<8x32xf32>
    %273 = vector.broadcast %253 : vector<1x32xf32> to vector<8x32xf32>
    %274 = arith.mulf %272, %273 : vector<8x32xf32>
    %275 = vector.broadcast %254 : vector<1x32xf32> to vector<8x32xf32>
    %276 = arith.addf %274, %275 : vector<8x32xf32>
    %cst_126 = arith.constant 0.000000e+00 : f32
    %277 = vector.broadcast %cst_126 : f32 to vector<8x32xf32>
    %278 = arith.maximumf %276, %277 : vector<8x32xf32>
    %c0_127 = arith.constant 0 : index
    %c0_128 = arith.constant 0 : index
    %279 = vector.load %arg21[%c0_127, %c0_128] : memref<32x16xf32, #tpu.memory_space<vmem>>, vector<32x16xf32>
    %cst_129 = arith.constant dense<0.000000e+00> : vector<8x16xf32>
    %280 = tpu.matmul %278, %279, %cst_129 {dimension_numbers = #tpu.dot_dimension_numbers<[1], [0], [0], [1], [0, 0, 1, 1], [], []>} : vector<8x32xf32>, vector<32x16xf32>, vector<8x16xf32> -> vector<8x16xf32>
    %c0_130 = arith.constant 0 : index
    %c0_131 = arith.constant 0 : index
    %281 = vector.load %arg22[%c0_130, %c0_131] : memref<1x16xf32, #tpu.memory_space<vmem>>, vector<1x16xf32>
    %282 = vector.broadcast %281 : vector<1x16xf32> to vector<8x16xf32>
    %283 = arith.addf %280, %282 : vector<8x16xf32>
    %c0_132 = arith.constant 0 : index
    %c0_133 = arith.constant 0 : index
    %c0_134 = arith.constant 0 : index
    %284 = vector.load %arg23[%c0_132, %c0_133, %c0_134] : memref<1x8x16xf32, #tpu.memory_space<vmem>>, vector<1x8x16xf32>
    %285 = vector.shape_cast %284 : vector<1x8x16xf32> to vector<8x16xf32>
    %286 = vector.shape_cast %283 : vector<8x16xf32> to vector<1x8x16xf32>
    tpu.vector_store %arg23[%c0_132, %c0_133, %c0_134], %286 {strides = array<i32>} : memref<1x8x16xf32, #tpu.memory_space<vmem>>, vector<1x8x16xf32>,
    return
  }
  func.func @transform_0(%arg0: i32) -> (i32, i32, i32) {
    %c0_i32 = arith.constant 0 : i32
    %c0_i32_0 = arith.constant 0 : i32
    %c0_i32_1 = arith.constant 0 : i32
    return %arg0, %c0_i32, %c0_i32_0 : i32, i32, i32
  }
  func.func @transform_1(%arg0: i32) -> (i32, i32) {
    %c0_i32 = arith.constant 0 : i32
    %c0_i32_0 = arith.constant 0 : i32
    %c0_i32_1 = arith.constant 0 : i32
    return %c0_i32, %c0_i32_0 : i32, i32
  }
  func.func @transform_2(%arg0: i32) -> (i32, i32) {
    %c0_i32 = arith.constant 0 : i32
    %c0_i32_0 = arith.constant 0 : i32
    %c0_i32_1 = arith.constant 0 : i32
    return %c0_i32, %c0_i32_0 : i32, i32
  }
  func.func @transform_3(%arg0: i32) -> (i32, i32) {
    %c0_i32 = arith.constant 0 : i32
    %c0_i32_0 = arith.constant 0 : i32
    %c0_i32_1 = arith.constant 0 : i32
    return %c0_i32, %c0_i32_0 : i32, i32
  }
  func.func @transform_4(%arg0: i32) -> (i32, i32) {
    %c0_i32 = arith.constant 0 : i32
    %c0_i32_0 = arith.constant 0 : i32
    %c0_i32_1 = arith.constant 0 : i32
    return %c0_i32, %c0_i32_0 : i32, i32
  }
  func.func @transform_5(%arg0: i32) -> (i32, i32) {
    %c0_i32 = arith.constant 0 : i32
    %c0_i32_0 = arith.constant 0 : i32
    %c0_i32_1 = arith.constant 0 : i32
    return %c0_i32, %c0_i32_0 : i32, i32
  }
  func.func @transform_6(%arg0: i32) -> (i32, i32) {
    %c0_i32 = arith.constant 0 : i32
    %c0_i32_0 = arith.constant 0 : i32
    %c0_i32_1 = arith.constant 0 : i32
    return %c0_i32, %c0_i32_0 : i32, i32
  }
  func.func @transform_7(%arg0: i32) -> (i32, i32) {
    %c0_i32 = arith.constant 0 : i32
    %c0_i32_0 = arith.constant 0 : i32
    %c0_i32_1 = arith.constant 0 : i32
    return %c0_i32, %c0_i32_0 : i32, i32
  }
  func.func @transform_8(%arg0: i32) -> (i32, i32) {
    %c0_i32 = arith.constant 0 : i32
    %c0_i32_0 = arith.constant 0 : i32
    %c0_i32_1 = arith.constant 0 : i32
    return %c0_i32, %c0_i32_0 : i32, i32
  }
  func.func @transform_9(%arg0: i32) -> (i32, i32) {
    %c0_i32 = arith.constant 0 : i32
    %c0_i32_0 = arith.constant 0 : i32
    %c0_i32_1 = arith.constant 0 : i32
    return %c0_i32, %c0_i32_0 : i32, i32
  }
  func.func @transform_10(%arg0: i32) -> (i32, i32) {
    %c0_i32 = arith.constant 0 : i32
    %c0_i32_0 = arith.constant 0 : i32
    %c0_i32_1 = arith.constant 0 : i32
    return %c0_i32, %c0_i32_0 : i32, i32
  }
  func.func @transform_11(%arg0: i32) -> (i32, i32) {
    %c0_i32 = arith.constant 0 : i32
    %c0_i32_0 = arith.constant 0 : i32
    %c0_i32_1 = arith.constant 0 : i32
    return %c0_i32, %c0_i32_0 : i32, i32
  }
  func.func @transform_12(%arg0: i32) -> (i32, i32) {
    %c0_i32 = arith.constant 0 : i32
    %c0_i32_0 = arith.constant 0 : i32
    %c0_i32_1 = arith.constant 0 : i32
    return %c0_i32, %c0_i32_0 : i32, i32
  }
  func.func @transform_13(%arg0: i32) -> (i32, i32) {
    %c0_i32 = arith.constant 0 : i32
    %c0_i32_0 = arith.constant 0 : i32
    %c0_i32_1 = arith.constant 0 : i32
    return %c0_i32, %c0_i32_0 : i32, i32
  }
  func.func @transform_14(%arg0: i32) -> (i32, i32) {
    %c0_i32 = arith.constant 0 : i32
    %c0_i32_0 = arith.constant 0 : i32
    %c0_i32_1 = arith.constant 0 : i32
    return %c0_i32, %c0_i32_0 : i32, i32
  }
  func.func @transform_15(%arg0: i32) -> (i32, i32) {
    %c0_i32 = arith.constant 0 : i32
    %c0_i32_0 = arith.constant 0 : i32
    %c0_i32_1 = arith.constant 0 : i32
    return %c0_i32, %c0_i32_0 : i32, i32
  }
  func.func @transform_16(%arg0: i32) -> (i32, i32) {
    %c0_i32 = arith.constant 0 : i32
    %c0_i32_0 = arith.constant 0 : i32
    %c0_i32_1 = arith.constant 0 : i32
    return %c0_i32, %c0_i32_0 : i32, i32
  }
  func.func @transform_17(%arg0: i32) -> (i32, i32) {
    %c0_i32 = arith.constant 0 : i32
    %c0_i32_0 = arith.constant 0 : i32
    %c0_i32_1 = arith.constant 0 : i32
    return %c0_i32, %c0_i32_0 : i32, i32
  }
  func.func @transform_18(%arg0: i32) -> (i32, i32) {
    %c0_i32 = arith.constant 0 : i32
    %c0_i32_0 = arith.constant 0 : i32
    %c0_i32_1 = arith.constant 0 : i32
    return %c0_i32, %c0_i32_0 : i32, i32
  }
  func.func @transform_19(%arg0: i32) -> (i32, i32) {
    %c0_i32 = arith.constant 0 : i32
    %c0_i32_0 = arith.constant 0 : i32
    %c0_i32_1 = arith.constant 0 : i32
    return %c0_i32, %c0_i32_0 : i32, i32
  }
  func.func @transform_20(%arg0: i32) -> (i32, i32) {
    %c0_i32 = arith.constant 0 : i32
    %c0_i32_0 = arith.constant 0 : i32
    %c0_i32_1 = arith.constant 0 : i32
    return %c0_i32, %c0_i32_0 : i32, i32
  }
  func.func @transform_21(%arg0: i32) -> (i32, i32) {
    %c0_i32 = arith.constant 0 : i32
    %c0_i32_0 = arith.constant 0 : i32
    %c0_i32_1 = arith.constant 0 : i32
    return %c0_i32, %c0_i32_0 : i32, i32
  }
  func.func @transform_22(%arg0: i32) -> (i32, i32, i32) {
    %c0_i32 = arith.constant 0 : i32
    %c0_i32_0 = arith.constant 0 : i32
    %c0_i32_1 = arith.constant 0 : i32
    return %arg0, %c0_i32, %c0_i32_0 : i32, i32, i32
  }
}

</mosaic_0001>

<bundles_post_ra>
// kernel: tpu_custom_call.1
= control target key start
LH: loop header
LB: loop body
LE: loop exit
PB: predicated region body
PF: predicated region fallthrough
CT: control target
= control target key end

     0   :  { %s4147_s0 = inlined_call_operand.vmem [shape: f32[2,8,32], index: 0, kind: input, shape index: {}]   ;;  %s4148_s1 = inlined_call_operand.hbm [shape: f32[8,24], index: 1, kind: input, shape index: {}]   ;;  %s4149_s2 = inlined_call_operand.vmem [shape: f32[32,64], index: 2, kind: input, shape index: {}]   ;;  %s4150_s3 = inlined_call_operand.hbm [shape: f32[1,64], index: 3, kind: input, shape index: {}]   ;;  %s4151_s4 = inlined_call_operand.vmem [shape: f32[24,32], index: 4, kind: input, shape index: {}]   ;;  %s4152_s5 = inlined_call_operand.hbm [shape: f32[1,32], index: 5, kind: input, shape index: {}]   ;;  %s4153_s6 = inlined_call_operand.vmem [shape: f32[32,16], index: 6, kind: input, shape index: {}]   ;;  %s4154_s7 = inlined_call_operand.hbm [shape: f32[1,16], index: 7, kind: input, shape index: {}]   ;;  %s4155_s8 = inlined_call_operand.hbm [shape: f32[1,16], index: 8, kind: input, shape index: {}]   ;;  %s4156_s9 = inlined_call_operand.hbm [shape: f32[1,16], index: 9, kind: input, shape index: {}]   ;;  %s4157_s10 = inlined_call_operand.vmem [shape: f32[16,64], index: 10, kind: input, shape index: {}]   ;;  %s4158_s11 = inlined_call_operand.vmem [shape: f32[1,64], index: 11, kind: input, shape index: {}]   ;;  %s4159_s12 = inlined_call_operand.hbm [shape: f32[1,16], index: 12, kind: input, shape index: {}]   ;;  %s4160_s13 = inlined_call_operand.hbm [shape: f32[1,16], index: 13, kind: input, shape index: {}]   ;;  %s4161_s14 = inlined_call_operand.vmem [shape: f32[16,8], index: 14, kind: input, shape index: {}]   ;;  %s4162_s15 = inlined_call_operand.vmem [shape: f32[1,8], index: 15, kind: input, shape index: {}]   ;;  %s4163_s16 = inlined_call_operand.vmem [shape: f32[32,32], index: 16, kind: input, shape index: {}]   ;;  %s4164_s17 = inlined_call_operand.vmem [shape: f32[1,32], index: 17, kind: input, shape index: {}]   ;;  %s4165_s18 = inlined_call_operand.vmem [shape: f32[1,32], index: 18, kind: input, shape index: {}]   ;;  %s4166_s19 = inlined_call_operand.vmem [shape: f32[1,32], index: 19, kind: input, shape index: {}]   ;;  %s4167_s20 = inlined_call_operand.vmem [shape: f32[32,16], index: 20, kind: input, shape index: {}]   ;;  %s4168_s21 = inlined_call_operand.vmem [shape: f32[1,16], index: 21, kind: input, shape index: {}]   ;;  %s4169_s22 = inlined_call_operand.hbm [shape: f32[2,8,16], index: 22, kind: output, shape index: {}]  }
   0x1   :  { %4185 = sst [smem:[#allocation29_spill]] %s4147_s0 }
   0x2   :  { %4186 = sst [smem:[#allocation30_spill]] %s4148_s1 }
   0x3   :  { %4187 = sst [smem:[#allocation31_spill]] %s4149_s2 }
   0x4   :  { %4188 = sst [smem:[#allocation32_spill]] %s4150_s3 }
   0x5   :  { %4189 = sst [smem:[#allocation33_spill]] %s4151_s4 }
   0x6   :  { %4190 = sst [smem:[#allocation34_spill]] %s4152_s5 }
   0x7   :  { %4191 = sst [smem:[#allocation35_spill]] %s4153_s6 }
   0x8   :  { %4192 = sst [smem:[#allocation36_spill]] %s4154_s7 }
   0x9   :  { %4193 = sst [smem:[#allocation37_spill]] %s4169_s22 }
   0xa   :  { %27 = vsyncpa [#allocation3], 0 }
   0xb   :  { %28 = vsyncpa [#allocation6], 0 }
   0xc   :  { %29 = vsyncpa [#allocation9], 0 }
   0xd   :  { %30 = vsyncpa [#allocation12], 0 }
   0xe   :  { %31 = vsyncpa [#allocation15], 0 }
   0xf   :  { %32 = vsyncpa [#allocation4], 0 }
  0x10   :  { %34 = vsyncpa [#allocation4 + $0x1], 0  ;;  %s3653_s3 = smov 0   ;;  %s3655_s28 = smov 0  }
  0x11   :  { %s3657_s29 = smov 0   ;;  %s3659_s30 = smov 0  }
  0x12 LB: > { %4194 = sst [smem:[#allocation23_spill]] %s3503_s3  ;;  %s3674_s4 = sadd.s32 4294967295, %s3515_s30   ;;  %s3515_s30 = sphi %s3659_s30, %s4230_s30   ;;  %s3511_s29 = sphi %s3657_s29, %s4232_s29   ;;  %s3507_s28 = sphi %s3655_s28, %s4234_s28   ;;  %s3503_s3 = sphi %s3653_s3, %s4233_s3  }
  0x13   : > { %4195 = sst [smem:[#allocation24_spill]] %s3511_s29  ;;  %s2808_s0 = sadd.s32 4294967294, %s3515_s30  }
  0x14   : > { %4196 = sst [smem:[#allocation25_spill]] %s3515_s30  ;;  %s3678_s23 = sadd.s32 1, %s3515_s30  }
  0x15   : > { %4197 = sst [smem:[#allocation26_spill]] %s3678_s23  ;;  %s514_s1 = sadd.s32 1, %s3511_s29 }
  0x16   : > { %s511_s5 = ssub.s32 %s3515_s30, %s3678_s23  ;;  %p524_p0 = scmp.ne.s32.totalorder %s3511_s29, %s3507_s28 }
  0x17   : > { %p512_p1 = scmp.eq.s32.totalorder %s511_s5, 0  ;;  %p525_p2 = scmp.eq.s32.totalorder %s3674_s4, 1 }
  0x18   : > { %p530_p3 = scmp.ne.s32.totalorder %s3507_s28, %s3503_s3  ;;  %p531_p4 = scmp.eq.s32.totalorder %s2808_s0, 1 }
  0x19   : > { %s3689_s24 = scalar_select %p512_p1, %s3511_s29, %s514_s1  }
  0x1a   : > { %p3691_p5 = por %p525_p2, %p524_p0  ;;  %p3695_p6 = por %p531_p4, %p530_p3 }
  0x1b   : > { %4198 = sst [smem:[#allocation27_spill]] %s3689_s24  ;;  %p2809_p7 = scmp.ge.s32.totalorder %s3515_s30, 1 }
  0x1c   : > { %s4199_s6 = scalar_select %p3691_p5, 1, 0 }
  0x1d   : > { %s4200_s25 = scalar_select %p3695_p6, 1, 0 }
  0x1e   : > { %p538_p8 = scmp.lt.s32.totalorder %s3515_s30, 3  ;;  %p4179_p9 = scmp.eq.s32.totalorder %s3674_s4, 0 }
  0x1f   : > { %4201 = sst [smem:[#allocation28_spill]] %s4200_s25  ;;  %s3517_s2 = smov [#allocation5]  }
  0x20   : > { %p3702_p10 = pnand %p2809_p7, %p538_p8  ;;  %s565_s27 = sshll.u32 %s3517_s2, 4  ;;  %s566_s27 = int_to_ptr.vmem [resolvable:$true] %s565_s27 }
  0x21   : > { %s3518_s0 = smov [#allocation8]   ;;  %s3519_s24 = smov [#allocation11]  }
  0x22   : > { %s4202_s26 = scalar_select %p3702_p10, 1, 0 }
  0x23   : > { %p3101_p11 = pneg %p3702_p10  ;;  %s593_s1 = sshll.u32 %s3518_s0, 4  ;;  %s594_s1 = int_to_ptr.vmem [resolvable:$true] %s593_s1 }
  0x24   : > { %s615_s29 = sshll.u32 %s3519_s24, 4  ;;  %s3238_s2 = scalar_lea.vmem %s566_s27, 16  ;;  %s3714_s29 = int_to_ptr.vmem [resolvable:$true] %s615_s29 }
  0x25   : > { %p3710_p12 = pnand %p4179_p9, %p3101_p11  ;;  %p3239_p0 = scmp.ne.s32.totalorder %s566_s27, %s3238_s2 }
  0x26   : > { %s3245_s0 = scalar_lea.vmem %s566_s27, 32  ;;  %p3246_p3 = scmp.lt.s32.totalorder %s566_s27, %s566_s27 }
  0x27   : > { %p3718_p13 = pneg %p3710_p12  ;;  %p3247_p4 = scmp.lt.s32.totalorder %s3245_s0, %s3238_s2 }
  0x29   : > { %p3241_p1 = pnand %p3239_p0, %p3718_p13  ;;  %p3248_p7 = por %p3247_p4, %p3246_p3 }
  0x2b   : > { %p3242_p2 = pneg %p3241_p1 }
  0x2d   : > { %p3249_p8 = pnand %p3248_p7, %p3242_p2 }
  0x2f   : > { %3252 = shalt.err (!%p3249_p8)
}
  0x30   : > { %s4205_s3 = sld [smem:[#allocation32_spill]]  ;;  %s3264_s30 = scalar_lea.vmem %s594_s1, 16 }
  0x31   : > { %p3265_p11 = scmp.ne.s32.totalorder %s594_s1, %s3264_s30  ;;  %s3271_s22 = scalar_lea.vmem %s594_s1, 32 }
  0x32   : > { %p3272_p0 = scmp.lt.s32.totalorder %s594_s1, %s594_s1  ;;  %p3273_p1 = scmp.lt.s32.totalorder %s3271_s22, %s3264_s30 }
  0x33   : > { %p3267_p9 = pnand %p3265_p11, %p3718_p13 }
  0x34   : > { %p3274_p5 = por %p3273_p1, %p3272_p0 }
  0x35   : > { %p3268_p6 = pneg %p3267_p9 }
  0x36   : > { %3107 = dma.hbm_to_vmem [thread:$0]  (!%p3710_p12), %s4205_s3, 16, %s566_s27, [#allocation6]  }
  0x37   : > { %p3275_p10 = pnand %p3274_p5, %p3268_p6 }
  0x39   : > { %3278 = shalt.err (!%p3275_p10)
}
  0x3a   : > { %s4206_s7 = sld [smem:[#allocation36_spill]]  ;;  %s3290_s3 = scalar_lea.vmem %s3714_s29, 16 }
  0x3b   : > { %p3291_p2 = scmp.ne.s32.totalorder %s3714_s29, %s3290_s3  ;;  %s3297_s22 = scalar_lea.vmem %s3714_s29, 32 }
  0x3c   : > { %p3298_p5 = scmp.lt.s32.totalorder %s3714_s29, %s3714_s29  ;;  %p3299_p6 = scmp.lt.s32.totalorder %s3297_s22, %s3290_s3 }
  0x3d   : > { %p3293_p9 = pnand %p3291_p2, %p3718_p13 }
  0x3e   : > { %p3300_p10 = por %p3299_p6, %p3298_p5 }
  0x3f   : > { %p3294_p3 = pneg %p3293_p9 }
  0x40   : > { %3113 = dma.hbm_to_vmem [thread:$0]  (!%p3710_p12), %s4206_s7, 16, %s594_s1, [#allocation9]  }
  0x41   : > { %p3301_p4 = pnand %p3300_p10, %p3294_p3 }
  0x43   : > { %3304 = shalt.err (!%p3301_p4)
}
  0x44   : > { %3119 = dma.hbm_to_vmem [thread:$0]  (!%p3710_p12), %s4156_s9, 16, %s3714_s29, [#allocation12]  }
  0x45   : > { %s3520_s27 = smov [#allocation2]   ;;  %s3521_s24 = smov [#allocation7]  }
  0x46   : > { %s551_s1 = sshll.u32 %s3520_s27, 4  ;;  %s579_s2 = sshll.u32 %s3521_s24, 4  ;;  %s552_s1 = int_to_ptr.vmem [resolvable:$true] %s551_s1  ;;  %s580_s2 = int_to_ptr.vmem [resolvable:$true] %s579_s2 }
  0x47   : > { %s3316_s0 = scalar_lea.vmem %s552_s1, 128  ;;  %p3324_p0 = scmp.lt.s32.totalorder %s552_s1, %s552_s1 }
  0x48   : > { %p3317_p7 = scmp.ne.s32.totalorder %s552_s1, %s3316_s0  ;;  %p3325_p1 = scmp.lt.s32.totalorder %s3316_s0, %s3316_s0 }
  0x4a   : > { %p3319_p8 = pnand %p3317_p7, %p3718_p13  ;;  %p3326_p2 = por %p3325_p1, %p3324_p0 }
  0x4c   : > { %p3320_p11 = pneg %p3319_p8 }
  0x4e   : > { %p3327_p9 = pnand %p3326_p2, %p3320_p11 }
  0x50   : > { %3330 = shalt.err (!%p3327_p9)
}
  0x51   : > { %s4207_s29 = sld [smem:[#allocation30_spill]]  ;;  %s3342_s30 = scalar_lea.vmem %s580_s2, 16 }
  0x52   : > { %p3343_p3 = scmp.ne.s32.totalorder %s580_s2, %s3342_s30  ;;  %s3349_s25 = scalar_lea.vmem %s580_s2, 32 }
  0x53   : > { %p3350_p10 = scmp.lt.s32.totalorder %s580_s2, %s580_s2  ;;  %p3351_p4 = scmp.lt.s32.totalorder %s3349_s25, %s3342_s30 }
  0x54   : > { %p3345_p5 = pnand %p3343_p3, %p3718_p13 }
  0x55   : > { %p3352_p7 = por %p3351_p4, %p3350_p10 }
  0x56   : > { %p3346_p6 = pneg %p3345_p5 }
  0x57   : > { %3104 = dma.hbm_to_vmem [thread:$0]  (!%p3710_p12), %s4207_s29, 128, %s552_s1, [#allocation3]  }
  0x58   : > { %p3353_p8 = pnand %p3352_p7, %p3346_p6 }
  0x5a   : > { %3356 = shalt.err (!%p3353_p8)
}
  0x5b   : > { %s4208_s0 = sld [smem:[#allocation34_spill]]  ;;  %s3522_s1 = smov [#allocation10]  }
  0x5c   : > { %s604_s3 = sshll.u32 %s3522_s1, 4  ;;  %s3523_s22 = smov [#allocation13]   ;;  %s605_s3 = int_to_ptr.vmem [resolvable:$true] %s604_s3 }
  0x5d   : > { %s632_s29 = sshll.u32 %s3523_s22, 4  ;;  %s3368_s7 = scalar_lea.vmem %s605_s3, 16  ;;  %s633_s29 = int_to_ptr.vmem [resolvable:$true] %s632_s29 }
  0x5e   : > { %p3369_p11 = scmp.ne.s32.totalorder %s605_s3, %s3368_s7  ;;  %s3375_s30 = scalar_lea.vmem %s605_s3, 32 }
  0x5f   : > { %p3376_p2 = scmp.lt.s32.totalorder %s605_s3, %s605_s3  ;;  %p3377_p9 = scmp.lt.s32.totalorder %s3375_s30, %s3368_s7 }
  0x60   : > { %p3371_p0 = pnand %p3369_p11, %p3718_p13 }
  0x61   : > { %3110 = dma.hbm_to_vmem [thread:$0]  (!%p3710_p12), %s4208_s0, 16, %s580_s2, [#allocation6]  }
  0x62   : > { %p3372_p1 = pneg %p3371_p0  ;;  %p3378_p3 = por %p3377_p9, %p3376_p2 }
  0x64   : > { %p3379_p5 = pnand %p3378_p3, %p3372_p1 }
  0x66   : > { %3382 = shalt.err (!%p3379_p5)
}
  0x67   : > { %3116 = dma.hbm_to_vmem [thread:$0]  (!%p3710_p12), %s4155_s8, 16, %s605_s3, [#allocation9]  }
  0x68   : > { %s3394_s27 = scalar_lea.vmem %s633_s29, 16  ;;  %s3401_s24 = scalar_lea.vmem %s633_s29, 32 }
  0x69   : > { %p3395_p6 = scmp.ne.s32.totalorder %s633_s29, %s3394_s27  ;;  %p3402_p7 = scmp.lt.s32.totalorder %s633_s29, %s633_s29 }
  0x6a   : > { %p3403_p8 = scmp.lt.s32.totalorder %s3401_s24, %s3394_s27 }
  0x6b   : > { %p3397_p10 = pnand %p3395_p6, %p3718_p13 }
  0x6c   : > { %p3404_p11 = por %p3403_p8, %p3402_p7 }
  0x6d   : > { %p3398_p4 = pneg %p3397_p10 }
  0x6f   : > { %p3405_p0 = pnand %p3404_p11, %p3398_p4 }
  0x71   : > { %3408 = shalt.err (!%p3405_p0)
}
  0x72   : > { %3122 = dma.hbm_to_vmem [thread:$0]  (!%p3710_p12), %s4159_s12, 16, %s633_s29, [#allocation12]  }
  0x73   : > { %s3524_s1 = smov [#allocation14]  }
  0x74   : > { %s643_s3 = sshll.u32 %s3524_s1, 4  ;;  %s644_s3 = int_to_ptr.vmem [resolvable:$true] %s643_s3 }
  0x75   : > { %s3420_s22 = scalar_lea.vmem %s644_s3, 16  ;;  %s3427_s30 = scalar_lea.vmem %s644_s3, 32 }
  0x76   : > { %p3421_p1 = scmp.ne.s32.totalorder %s644_s3, %s3420_s22  ;;  %p3428_p3 = scmp.lt.s32.totalorder %s644_s3, %s644_s3 }
  0x77   : > { %p3429_p5 = scmp.lt.s32.totalorder %s3427_s30, %s3420_s22 }
  0x78   : > { %p3423_p2 = pnand %p3421_p1, %p3718_p13 }
  0x79   : > { %p3430_p6 = por %p3429_p5, %p3428_p3 }
  0x7a   : > { %p3424_p9 = pneg %p3423_p2 }
  0x7c   : > { %p3431_p10 = pnand %p3430_p6, %p3424_p9 }
  0x7e   : > { %3434 = shalt.err (!%p3431_p10)
}
  0x7f   : > { %3125 = dma.hbm_to_vmem [thread:$0]  (!%p3710_p12), %s4160_s13, 16, %s644_s3, [#allocation15]  }
  0x80   : > { %p4209_p4 = scmp.ne.s32.totalorder %s4202_s26, 0 }
  0x81   : > { %p4210_p7 = scmp.eq.s32.totalorder (!%p4209_p4), %s3674_s4, 0 }
  0x82   : > { %687 = sbr.rel (%p4209_p4) target bundleno = 4588 (0x11ec), region = 108 }
  0x87   : > { %3478 = dma.done.wait (%p4210_p7), [#allocation3], 128   ;;  %p4211_p13 = pmov %p4210_p7 }
  0x88   : > { %p4212_p8 = pmov %p4210_p7 }
  0x89   : > { %3480 = vsyncadd (%p4211_p13), [#allocation3], 4294967168 }
  0x8a   : > { %3482 = dma.done.wait (%p4212_p8), [#allocation6], 32   ;;  %p4213_p11 = pmov %p4210_p7 }
  0x8b   : > { %p4214_p0 = pmov %p4210_p7 }
  0x8c   : > { %3484 = vsyncadd (%p4213_p11), [#allocation6], 4294967264 }
  0x8d   : > { %3486 = dma.done.wait (%p4214_p0), [#allocation9], 32   ;;  %p4215_p12 = pmov %p4214_p0 }
  0x8e   : > { %p4216_p1 = pmov %p4214_p0 }
  0x8f   : > { %3488 = vsyncadd (%p4215_p12), [#allocation9], 4294967264 }
  0x90   : > { %3490 = dma.done.wait (%p4216_p1), [#allocation12], 32   ;;  %p4217_p2 = pmov %p4214_p0 }
  0x91   : > { %p4218_p9 = pmov %p4214_p0 }
  0x92   : > { %3492 = vsyncadd (%p4217_p2), [#allocation12], 4294967264 }
  0x93   : > { %3494 = dma.done.wait (%p4218_p9), [#allocation15], 16   ;;  %p4219_p3 = pmov %p4214_p0 }
  0x94   : > { %p776_p5 = scmp.lt.s32.totalorder %s3674_s4, 1  ;;  %v3525_v0 = vmov 0.0   ;;  %vm3526_vm0 = vmmov 0   ;;  %s4220_s27 = sld [smem:[#allocation31_spill]]  ;;  %v866_v7 = vld [vmem:[#allocation2] sm:$0xff]  ;;  %vm877_vm1 = vcmask 195584  }
  0x95   : > { %3496 = vsyncadd (%p4219_p3), [#allocation15], 4294967280  ;;  %2930 = vmatprep.subr.mxu0 %v3525_v0  ;;  %2941 = vmatprep.subr.mxu1 %v3525_v0  ;;  %s4221_s0 = sld [smem:[#allocation33_spill]]  ;;  %vm792_vm2 = vcmask 261120   ;;  %v2830_v15 = vld [vmem:[#allocation5] ss:$0 sm:$0xff] }
  0x96   : > { %2947 = vmatprep.mubr.msk.f32.mxu1 %vm3526_vm0, %v3525_v0  ;;  %2938 = vmatprep.mubr.msk.f32.mxu0 %vm3526_vm0, %v3525_v0  ;;  %s777_s23 = scalar_select %p776_p5, %s3674_s4, 1  ;;  %vm1149_vm3 = vcmask 64512   ;;  %v2832_v18 = vld [vmem:[#allocation7] ss:$0 sm:$0xff]  ;;  %v2834_v22 = vld [vmem:[#allocation8] ss:$0 sm:$0xff] }
  0x97   : > { %s4222_s7 = sld [smem:[#allocation29_spill]]  ;;  %vm1034_vm4 = vcmask 130048   ;;  %v1064_v32 = vld [vmem:[%s4157_s10 + $0x8] sm:$0xff]  ;;  %v1063_v33 = vld [vmem:[%s4157_s10] sm:$0xff]  ;;  %v2837_v42 = vld [vmem:[#allocation11] ss:$0 sm:$0xff] }
  0x98   : > { %s2829_s26 = sshll.u32 %s777_s23, 3  ;;  %s4223_s2 = sld [smem:[#allocation35_spill]]  ;;  %v2836_v40 = vld [vmem:[#allocation10] ss:$0 sm:$0xff]  ;;  %v2838_v45 = vld [vmem:[%s4158_s11] ss:$0 sm:$0xff] }
  0x99   : > { %s3527_s23 = smov 112   ;;  %v3914_v57 = vld [vmem:[%s4161_s14 + $0x8] sm:$0xff]  ;;  %v3919_v58 = vld [vmem:[%s4161_s14] sm:$0xff]  ;;  %s3529_s3 = smov 120  }
  0x9a   : > { %v784_v1 = vld [vmem:[%s4220_s27 + $0x18] sm:$0xff]  ;;  %v783_v3 = vld [vmem:[%s4220_s27 + $0x10] sm:$0xff]  ;;  %v782_v5 = vld [vmem:[%s4220_s27 + $0x8] sm:$0xff]  ;;  %s3530_s25 = smov 96   ;;  %s3532_s5 = smov 32  }
  0x9b   : > { %v869_v2 = vld [vmem:[%s4221_s0 + $0x10] sm:$0xff]  ;;  %2931 = vmatpush3.msra.mxu0 %v784_v1  ;;  %v868_v4 = vld [vmem:[%s4221_s0 + $0x8] sm:$0xff]  ;;  %v867_v6 = vld [vmem:[%s4221_s0] sm:$0xff]  ;;  %s3535_s22 = smov 88   ;;  %p4225_p10 = scmp.ne.s32.totalorder %s4199_s6, 0 }
  0x9c   : > { %2942 = vmatpush3.msra.mxu1 %v869_v2  ;;  %2932 = vmatprep.subr.mxu0 %v3525_v0  ;;  %v781_v8 = vld [vmem:[%s4220_s27] sm:$0xff] }
  0x9d   : > { %2943 = vmatprep.subr.mxu1 %v3525_v0  ;;  %s779_s1 = scalar_lea.vmem %s4222_s7, %s2829_s26  ;;  %2933 = vmatpush3.msra.mxu0 %v783_v3  ;;  %s3531_s26 = smov 104  }
  0x9e   : > { %2944 = vmatpush3.msra.mxu1 %v868_v4  ;;  %2934 = vmatprep.subr.mxu0 %v3525_v0  ;;  %v954_v9 = vld [vmem:[%s4223_s2 + $0x18] sm:$0xff]  ;;  %v3845_v10 = vld [vmem:[%s779_s1] sm:$0xff]  ;;  %v953_v11 = vld [vmem:[%s4223_s2 + $0x10] sm:$0xff]  ;;  %s3528_s1 = smov 16  }
  0x9f   : > { %2945 = vmatprep.subr.mxu1 %v3525_v0  ;;  %2935 = vmatpush3.msra.mxu0 %v782_v5  ;;  %v952_v12 = vld [vmem:[%s4223_s2 + $0x8] sm:$0xff]  ;;  %v951_v13 = vld [vmem:[%s4223_s2] sm:$0xff]  ;;  %v3927_v4 = vld [vmem:[#allocation13] ss:$0 sm:$0xff] }
  0xa0   : > { %2946 = vmatpush3.msra.mxu1 %v867_v6  ;;  %2936 = vmatprep.subr.mxu0 %v3525_v0  ;;  %v3929_v6 = vld [vmem:[#allocation14] ss:$0 sm:$0xff] }
  0xa1   : > { %2948 = vmatmul.mubr.msk.f32.vlgmr.msra.gmra.mxu1 %vm877_vm1, %v866_v7  ;;  %2950 = vmatprep.subr.mxu1 %v3525_v0 }
  0xa2   : > { %2937 = vmatpush3.msra.mxu0 %v781_v8  ;;  %2951 = vmatpush3.msra.mxu1 %v954_v9 }
  0xa3   : > { %2939 = vmatmul.mubr.msk.f32.vlgmr.msra.gmra.mxu0 %vm792_vm2, %v3845_v10  ;;  %2952 = vmatprep.subr.mxu1 %v3525_v0 }
  0xa4   : > { %2958 = vmatprep.mubr.msk.f32.mxu1 %vm3526_vm0, %v3525_v0  ;;  %2953 = vmatpush3.msra.mxu1 %v953_v11 }
  0xa5   : > { %2968 = vmatprep.subr.mxu0 %v3525_v0  ;;  %2954 = vmatprep.subr.mxu1 %v3525_v0 }
  0xa6   : > { %2970 = vmatprep.mubr.msk.f32.mxu0 %vm3526_vm0, %v3525_v0  ;;  %2955 = vmatpush3.msra.mxu1 %v952_v12  ;;  %v3945_v12 = vld [vmem:[%s4162_s15] ss:$0 sm:$0xff] }
  0xa7   : > { %2956 = vmatprep.subr.mxu1 %v3525_v0 }
  0xa8   : > { %2957 = vmatpush3.msra.mxu1 %v951_v13 }
  0xa9   : > { %2959 = vmatmul.mubr.msk.f32.vlgmr.msra.gmra.mxu1 %vm792_vm2, %v3845_v10  ;;  %2961 = vmatprep.subr.mxu1 %v3525_v0 }
  0xaa   : > { %2965 = vmatprep.mubr.msk.f32.mxu1 %vm3526_vm0, %v3525_v0  ;;  %2962 = vmatpush3.msra.mxu1 %v1064_v32 }
  0xab   : > { %2963 = vmatprep.subr.mxu1 %v3525_v0 }
  0xac   : > { %2964 = vmatpush3.msra.mxu1 %v1063_v33 }
  0xad   : > { %2973 = vmatprep.subr.mxu1 %v3525_v0 }
 0x161   : > { %v947_v14 = vpop.f32.mrf.mxu1 }
 0x162   : > { %v3877_v21 = vadd.f32 %v2832_v18, %v947_v14 }
 0x163   : > { %v862_v16 = vpop.f32.mrf.mxu0  ;;  %v2949_v17 = vpop.f32.mrf.mxu1 }
 0x164   : > { %v3873_v19 = vadd.f32 %v2830_v15, %v862_v16 }
 0x165   : > { %v2940_v20 = vpop.f32.mrf.mxu0 }
 0x166   : > { %2969 = vmatpush3.xpose.msk.msra.mxu0 %vm1149_vm3, %v3873_v19 }
 0x167   : > { %2980 = vmatprep.subr.mxu0 %v3525_v0 }
 0x169   : > { %2971 = vmatmul.mubr.msk.f32.vlgmr.msra.gmra.mxu0 %vm1149_vm3, %v3877_v21  ;;  %v1028_v23 = vpop.f32.mrf.mxu1 }
 0x16a   : > { %2982 = vmatprep.mubr.msk.f32.mxu0 %vm3526_vm0, %v3525_v0  ;;  %v1029_v24 = vadd.f32 %v2834_v22, %v1028_v23 }
 0x16b   : > { %v2960_v25 = vpop.f32.mrf.mxu1 }
 0x16c   : > { %v1035_v26 = vsel %vm1034_vm4, %v1029_v24, 0.0 }
 0x16d   : > { %1036 = vadd.xlane.f32.xlu0 %v1035_v26 }
 0x1f6   : > { %v1037_v27 = vpop.xlane.xlu0 %1036 }
 0x1f7   : > { %v1039_v28 = vmul.f32 0.0625, %v1037_v27 }
 0x1f9   : > { %v1040_v29 = vsub.f32 %v1029_v24, %v1039_v28 }
 0x1fb   : > { %v1041_v30 = vmul.f32 %v1040_v29, %v1040_v29 }
 0x1fd   : > { %v1042_v31 = vsel %vm1034_vm4, %v1041_v30, 0.0 }
 0x1fe   : > { %1043 = vadd.xlane.f32.xlu0 %v1042_v31 }
 0x229   : > { %v3894_v34 = vpop.f32.mrf.mxu0 }
 0x22a   : > { %v1226_v14 = vmul.f32 0.35355338, %v3894_v34 }
 0x22b   : > { %v2972_v35 = vpop.f32.mrf.mxu0 }
 0x287   : > { %v1044_v36 = vpop.xlane.xlu0 %1043 }
 0x288   : > { %v1045_v37 = vmul.f32 0.0625, %v1044_v36 }
 0x28a   : > { %v1046_v38 = vadd.f32 1e-05, %v1045_v37 }
 0x28c   : > { %3199 = vrsqrt.f32 %v1046_v38 }
 0x299   : > { %v3200_v39 = vpop.eup %3199 }
 0x29a   : > { %v1048_v41 = vmul.f32 %v3200_v39, %v1040_v29 }
 0x29c   : > { %v1055_v43 = vmul.f32 %v2836_v40, %v1048_v41 }
 0x29e   : > { %v1062_v44 = vadd.f32 %v2837_v42, %v1055_v43 }
 0x2a0   : > { %2966 = vmatmul.mubr.msk.f32.vlgmr.msra.gmra.mxu1 %vm1034_vm4, %v1062_v44 }
 0x2a1   : > { %2977 = vmatprep.mubr.msk.f32.mxu1 %vm3526_vm0, %v3525_v0  ;;  %2974 = vmatpush3.msra.mxu1 %v3914_v57 }
 0x2a2   : > { %2975 = vmatprep.subr.mxu1 %v3525_v0 }
 0x2a3   : > { %2976 = vmatpush3.msra.mxu1 %v3919_v58 }
 0x2a4   : > { %2985 = vmatprep.subr.mxu1 %v3525_v0 }
 0x360   : > { %v1141_v46 = vpop.f32.mrf.mxu1 }
 0x361   : > { %v3902_v47 = vadd.f32 %v2838_v45, %v1141_v46 }
 0x362   : > { %v2967_v48 = vpop.f32.mrf.mxu1 }
 0x363   : > { %1506 = vrot.lane.b32.xlu0 %v3902_v47, %s3527_s23  ;;  %v1229_v49 = vsel %vm1034_vm4, %v3902_v47, 0.0 }
 0x364   : > { %1230 = vadd.xlane.f32.xlu1 %v1229_v49 }
 0x3d5   : > { %v1507_v55 = vpop.permute.xlu0 %1506 }
 0x3d6   : > { %v1509_v56 = vsel %vm1034_vm4, %v1507_v55, 0.0 }
 0x3ed   : > { %v1231_v50 = vpop.xlane.xlu1 %1230 }
 0x3ee   : > { %v1232_v51 = vmul.f32 0.0625, %v1231_v50 }
 0x3f0   : > { %v1233_v52 = vsub.f32 %v3902_v47, %v1232_v51 }
 0x3f2   : > { %v1234_v53 = vmul.f32 %v1233_v52, %v1233_v52 }
 0x3f4   : > { %v1235_v54 = vsel %vm1034_vm4, %v1234_v53, 0.0 }
 0x3f5   : > { %1236 = vadd.xlane.f32.xlu1 %v1235_v54 }
 0x3f9   : > { %1510 = vadd.xlane.f32.xlu1 %v1509_v56 }
 0x47e   : > { %v1237_v59 = vpop.xlane.xlu1 %1236 }
 0x47f   : > { %v1238_v60 = vmul.f32 0.0625, %v1237_v59 }
 0x481   : > { %v1239_v61 = vadd.f32 1e-05, %v1238_v60 }
 0x482   : > { %v1511_v62 = vpop.xlane.xlu1 %1510 }
 0x483   : > { %3201 = vrsqrt.f32 %v1239_v61  ;;  %v1512_v63 = vmul.f32 0.0625, %v1511_v62 }
 0x485   : > { %v1513_v1 = vsub.f32 %v3902_v47, %v1512_v63 }
 0x487   : > { %v1514_v2 = vmul.f32 %v1513_v1, %v1513_v1 }
 0x489   : > { %1516 = vrot.lane.b32.xlu1 %v1514_v2, %s3527_s23 }
 0x490   : > { %v3202_v3 = vpop.eup %3201 }
 0x491   : > { %v1241_v5 = vmul.f32 %v3202_v3, %v1233_v52 }
 0x493   : > { %v1248_v7 = vmul.f32 %v3927_v4, %v1241_v5 }
 0x495   : > { %v1255_v8 = vadd.f32 %v3929_v6, %v1248_v7 }
 0x497   : > { %2978 = vmatmul.mubr.msk.f32.vlgmr.msra.gmra.mxu1 %vm1034_vm4, %v1255_v8 }
 0x498   : > { %2987 = vmatprep.mubr.msk.f32.mxu1 %vm3526_vm0, %v3525_v0 }
 0x4fb   : > { %v1517_v9 = vpop.permute.xlu1 %1516 }
 0x4fc   : > { %v1519_v11 = vsel %vm1034_vm4, %v1517_v9, 0.0 }
 0x4fd   : > { %1520 = vadd.xlane.f32.xlu0 %v1519_v11 }
 0x513   : > { %1526 = vrot.lane.b32.xlu0 %v3927_v4, %s3528_s1 }
 0x517   : > { %1350 = vrot.lane.b32.xlu0 %v3873_v19, %s3529_s3 }
 0x51b   : > { %1428 = vrot.lane.b32.xlu0 %v3873_v19, %s3527_s23 }
 0x51f   : > { %1426 = vrot.lane.b32.xlu0 %v3877_v21, %s3529_s3  ;;  %s3534_s3 = smov 48  }
 0x557   : > { %v1334_v13 = vpop.f32.mrf.mxu1 }
 0x558   : > { %v1335_v15 = vadd.f32 %v3945_v12, %v1334_v13  ;;  %v1145_v13 = vld [vmem:[%s4163_s16] sm:$0xff] }
 0x559   : > { %v2979_v16 = vpop.f32.mrf.mxu1 }
 0x55a   : > { %v1338_v17 = vadd.f32 %v1335_v15, %v1226_v14  ;;  %v1146_v14 = vld [vmem:[%s4163_s16 + $0x8] sm:$0xff] }
 0x55c   : > { %v1339_v18 = vsel %vm1149_vm3, %v1338_v17, -inf }
 0x55d   : > { %1340 = vmax.xlane.f32.xlu1 %v1339_v18 }
 0x56e   : > { %1530 = vrot.lane.b32.xlu1 %v3929_v6, %s3528_s1  ;;  %s3533_s1 = smov 80  }
 0x586   : > { %v1521_v20 = vpop.xlane.xlu0 %1520 }
 0x587   : > { %v1522_v22 = vmul.f32 0.0625, %v1521_v20 }
 0x589   : > { %v1523_v23 = vadd.f32 1e-05, %v1522_v22 }
 0x58a   : > { %v1527_v24 = vpop.permute.xlu0 %1526 }
 0x58b   : > { %3203 = vrsqrt.f32 %v1523_v23 }
 0x58e   : > { %v1351_v25 = vpop.permute.xlu0 %1350 }
 0x58f   : > { %2981 = vmatpush3.msra.mxu0 %v1351_v25 }
 0x590   : > { %2990 = vmatprep.subr.mxu0 %v3525_v0 }
 0x592   : > { %v1429_v26 = vpop.permute.xlu0 %1428 }
 0x593   : > { %2986 = vmatpush3.xpose.msk.msra.mxu1 %vm1149_vm3, %v1429_v26 }
 0x594   : > { %2997 = vmatprep.subr.mxu1 %v3525_v0 }
 0x596   : > { %v1427_v27 = vpop.permute.xlu0 %1426 }
 0x597   : > { %2988 = vmatmul.mubr.msk.f32.vlgmr.msra.gmra.mxu1 %vm1149_vm3, %v1427_v27 }
 0x598   : > { %v3204_v28 = vpop.eup %3203  ;;  %2999 = vmatprep.mubr.msk.f32.mxu1 %vm3526_vm0, %v3525_v0 }
 0x599   : > { %v1525_v29 = vmul.f32 %v3204_v28, %v1513_v1 }
 0x59b   : > { %v1529_v30 = vmul.f32 %v1527_v24, %v1525_v29 }
 0x5e6   : > { %v1341_v31 = vpop.xlane.xlu1 %1340 }
 0x5e7   : > { %v1342_v32 = vsub.f32 %v1338_v17, %v1341_v31 }
 0x5e9   : > { %v1343_v33 = vmul.f32 1.442695, %v1342_v32 }
 0x5ea   : > { %v1531_v34 = vpop.permute.xlu1 %1530 }
 0x5eb   : > { %3205 = vpow2.f32 %v1343_v33  ;;  %v1533_v35 = vadd.f32 %v1531_v34, %v1529_v30 }
 0x5ed   : > { %1535 = vrot.lane.b32.xlu0 %v1533_v35, %s3527_s23 }
 0x5f8   : > { %v3206_v36 = vpop.eup %3205 }
 0x5f9   : > { %v1345_v37 = vsel %vm1149_vm3, %v3206_v36, 0.0 }
 0x5fa   : > { %1346 = vadd.xlane.f32.xlu1 %v1345_v37 }
 0x60b   : > { %1922 = vrot.lane.b32.xlu1 %v3902_v47, %s3530_s25 }
 0x60f   : > { %1621 = vrot.lane.b32.xlu1 %v3873_v19, %s3531_s26 }
 0x657   : > { %v1500_v38 = vpop.f32.mrf.mxu1 }
 0x658   : > { %v1504_v50 = vmul.f32 0.35355338, %v1500_v38 }
 0x659   : > { %v2989_v39 = vpop.f32.mrf.mxu1 }
 0x65f   : > { %v1536_v45 = vpop.permute.xlu0 %1535 }
 0x683   : > { %v1347_v40 = vpop.xlane.xlu1 %1346 }
 0x684   : > { %3207 = vrcp.f32 %v1347_v40 }
 0x687   : > { %v1923_v41 = vpop.permute.xlu1 %1922 }
 0x688   : > { %v1925_v55 = vsel %vm1034_vm4, %v1923_v41, 0.0 }
 0x68b   : > { %v1622_v42 = vpop.permute.xlu1 %1621 }
 0x68c   : > { %2998 = vmatpush3.msra.mxu1 %v1622_v42 }
 0x68d   : > { %3007 = vmatprep.subr.mxu1 %v3525_v0 }
 0x691   : > { %v3208_v43 = vpop.eup %3207 }
 0x692   : > { %v1349_v44 = vmul.f32 %v3208_v43, %v3206_v36 }
 0x694   : > { %2983 = vmatmul.mubr.msk.f32.vlgmr.msra.gmra.mxu0 %vm1149_vm3, %v1349_v44 }
 0x695   : > { %2991 = vmatpush3.msra.mxu0 %v3914_v57  ;;  %2994 = vmatprep.mubr.msk.f32.mxu0 %vm3526_vm0, %v3525_v0 }
 0x696   : > { %2992 = vmatprep.subr.mxu0 %v3525_v0 }
 0x697   : > { %2993 = vmatpush3.msra.mxu0 %v3919_v58 }
 0x698   : > { %2995 = vmatmul.mubr.msk.f32.vlgmr.msra.gmra.mxu0 %vm1034_vm4, %v1536_v45  ;;  %3002 = vmatprep.subr.mxu0 %v3525_v0 }
 0x699   : > { %3004 = vmatprep.mubr.msk.f32.mxu0 %vm3526_vm0, %v3525_v0  ;;  %3003 = vmatpush3.msra.mxu0 %v1146_v14 }
 0x69a   : > { %3012 = vmatprep.subr.mxu0 %v3525_v0 }
 0x754   : > { %v1422_v46 = vpop.f32.mrf.mxu0 }
 0x756   : > { %v2984_v48 = vpop.f32.mrf.mxu0 }
 0x758   : > { %v1605_v49 = vpop.f32.mrf.mxu0 }
 0x759   : > { %v1606_v51 = vadd.f32 %v3945_v12, %v1605_v49 }
 0x75a   : > { %v2996_v52 = vpop.f32.mrf.mxu0 }
 0x75b   : > { %v1609_v53 = vadd.f32 %v1606_v51, %v1504_v50 }
 0x75d   : > { %v1610_v54 = vsel %vm1149_vm3, %v1609_v53, -inf }
 0x75e   : > { %1611 = vmax.xlane.f32.xlu0 %v1610_v54 }
 0x762   : > { %1926 = vadd.xlane.f32.xlu0 %v1925_v55 }
 0x7e7   : > { %v1612_v56 = vpop.xlane.xlu0 %1611 }
 0x7e8   : > { %v1613_v59 = vsub.f32 %v1609_v53, %v1612_v56 }
 0x7ea   : > { %v1614_v60 = vmul.f32 1.442695, %v1613_v59 }
 0x7eb   : > { %v1927_v63 = vpop.xlane.xlu0 %1926 }
 0x7ec   : > { %3209 = vpow2.f32 %v1614_v60  ;;  %v1928_v1 = vmul.f32 0.0625, %v1927_v63 }
 0x7ee   : > { %v1929_v2 = vsub.f32 %v3902_v47, %v1928_v1 }
 0x7f0   : > { %v1930_v3 = vmul.f32 %v1929_v2, %v1929_v2 }
 0x7f9   : > { %v3210_v61 = vpop.eup %3209 }
 0x7fa   : > { %v1616_v62 = vsel %vm1149_vm3, %v3210_v61, 0.0 }
 0x7fb   : > { %1617 = vadd.xlane.f32.xlu0 %v1616_v62 }
 0x811   : > { %1932 = vrot.lane.b32.xlu0 %v1930_v3, %s3530_s25  ;;  %v1147_v3 = vld [vmem:[%s4163_s16 + $0x10] sm:$0xff] }
 0x815   : > { %1942 = vrot.lane.b32.xlu0 %v3927_v4, %s3532_s5 }
 0x819   : > { %1946 = vrot.lane.b32.xlu0 %v3929_v6, %s3532_s5 }
 0x81d   : > { %1845 = vrot.lane.b32.xlu0 %v3873_v19, %s3530_s25 }
 0x821   : > { %1843 = vrot.lane.b32.xlu0 %v3877_v21, %s3527_s23  ;;  %s4224_s23 = sld [smem:[#allocation37_spill]] }
 0x884   : > { %v1618_v5 = vpop.xlane.xlu0 %1617 }
 0x885   : > { %3211 = vrcp.f32 %v1618_v5 }
 0x888   : > { %v1933_v7 = vpop.permute.xlu0 %1932 }
 0x889   : > { %v1935_v8 = vsel %vm1034_vm4, %v1933_v7, 0.0 }
 0x88a   : > { %1936 = vadd.xlane.f32.xlu1 %v1935_v8 }
 0x88c   : > { %v1943_v18 = vpop.permute.xlu0 %1942 }
 0x890   : > { %v1947_v24 = vpop.permute.xlu0 %1946 }
 0x892   : > { %v3212_v9 = vpop.eup %3211 }
 0x893   : > { %v1620_v11 = vmul.f32 %v3212_v9, %v3210_v61 }
 0x894   : > { %v1846_v26 = vpop.permute.xlu0 %1845 }
 0x895   : > { %3000 = vmatmul.mubr.msk.f32.vlgmr.msra.gmra.mxu1 %vm1149_vm3, %v1620_v11 }
 0x896   : > { %3008 = vmatpush3.msra.mxu1 %v1145_v13  ;;  %3009 = vmatprep.mubr.msk.f32.mxu1 %vm3526_vm0, %v3525_v0 }
 0x897   : > { %3017 = vmatprep.subr.mxu1 %v3525_v0 }
 0x898   : > { %v1844_v29 = vpop.permute.xlu0 %1843 }
 0x899   : > { %3010 = vmatmul.mubr.msk.f32.vlgmr.msra.gmra.mxu1 %vm1149_vm3, %v1422_v46 }
 0x89a   : > { %3018 = vmatpush3.msra.mxu1 %v3914_v57  ;;  %3021 = vmatprep.mubr.msk.f32.mxu1 %vm3526_vm0, %v3525_v0 }
 0x89b   : > { %3019 = vmatprep.subr.mxu1 %v3525_v0 }
 0x89c   : > { %3020 = vmatpush3.msra.mxu1 %v3919_v58 }
 0x89d   : > { %3029 = vmatprep.subr.mxu1 %v3525_v0 }
 0x913   : > { %v1937_v15 = vpop.xlane.xlu1 %1936 }
 0x914   : > { %v1938_v16 = vmul.f32 0.0625, %v1937_v15 }
 0x916   : > { %v1939_v17 = vadd.f32 1e-05, %v1938_v16 }
 0x918   : > { %3213 = vrsqrt.f32 %v1939_v17 }
 0x925   : > { %v3214_v20 = vpop.eup %3213 }
 0x926   : > { %v1941_v22 = vmul.f32 %v3214_v20, %v1929_v2 }
 0x928   : > { %v1945_v23 = vmul.f32 %v1943_v18, %v1941_v22 }
 0x92a   : > { %v1949_v25 = vadd.f32 %v1947_v24, %v1945_v23 }
 0x92c   : > { %1951 = vrot.lane.b32.xlu1 %v1949_v25, %s3530_s25  ;;  %s2869_s25 = sshll.u32 %s3674_s4, 7  ;;  %s3537_s4 = smov [#allocation16]  }
 0x92d   : > { %s4111_s7 = scalar_lea.hbm %s4224_s23, %s2869_s25 }
 0x930   : > { %2266 = vrot.lane.b32.xlu1 %v3902_v47, %s3533_s1 }
 0x955   : > { %v1693_v27 = vpop.f32.mrf.mxu1 }
 0x956   : > { %3005 = vmatmul.mubr.msk.f32.vlgmr.msra.gmra.mxu0 %vm1149_vm3, %v1693_v27 }
 0x957   : > { %3013 = vmatpush3.xpose.msk.msra.mxu0 %vm1149_vm3, %v1846_v26  ;;  %v3001_v28 = vpop.f32.mrf.mxu1  ;;  %3014 = vmatprep.mubr.msk.f32.mxu0 %vm3526_vm0, %v3525_v0 }
 0x958   : > { %3024 = vmatprep.subr.mxu0 %v3525_v0 }
 0x959   : > { %v4013_v30 = vpop.f32.mrf.mxu1 }
 0x95a   : > { %3015 = vmatmul.mubr.msk.f32.vlgmr.msra.gmra.mxu0 %vm1149_vm3, %v1844_v29 }
 0x95b   : > { %v3011_v31 = vpop.f32.mrf.mxu1  ;;  %3026 = vmatprep.mubr.msk.f32.mxu0 %vm3526_vm0, %v3525_v0 }
 0x99e   : > { %v1952_v32 = vpop.permute.xlu1 %1951 }
 0x99f   : > { %3022 = vmatmul.mubr.msk.f32.vlgmr.msra.gmra.mxu1 %vm1034_vm4, %v1952_v32 }
 0x9a0   : > { %3031 = vmatprep.mubr.msk.f32.mxu1 %vm3526_vm0, %v3525_v0  ;;  %3030 = vmatpush3.msra.mxu1 %v1147_v3 }
 0x9a1   : > { %3039 = vmatprep.subr.mxu1 %v3525_v0 }
 0x9a2   : > { %v2267_v33 = vpop.permute.xlu1 %2266 }
 0x9a3   : > { %v2269_v34 = vsel %vm1034_vm4, %v2267_v33, 0.0 }
 0x9a4   : > { %2270 = vadd.xlane.f32.xlu1 %v2269_v34 }
 0xa16   : > { %v4022_v35 = vpop.f32.mrf.mxu0 }
 0xa18   : > { %v3006_v36 = vpop.f32.mrf.mxu0 }
 0xa1a   : > { %v1917_v37 = vpop.f32.mrf.mxu0 }
 0xa1b   : > { %v1921_v44 = vmul.f32 0.35355338, %v1917_v37 }
 0xa1c   : > { %v3016_v38 = vpop.f32.mrf.mxu0 }
 0xa1d   : > { %v2863_v38 = vld [vmem:[%s4164_s17] ss:$0 sm:$0xff] }
 0xa2d   : > { %v2271_v39 = vpop.xlane.xlu1 %2270 }
 0xa2e   : > { %v2272_v40 = vmul.f32 0.0625, %v2271_v39 }
 0xa30   : > { %v2273_v41 = vsub.f32 %v3902_v47, %v2272_v40 }
 0xa32   : > { %v2274_v42 = vmul.f32 %v2273_v41, %v2273_v41 }
 0xa34   : > { %2276 = vrot.lane.b32.xlu1 %v2274_v42, %s3533_s1 }
 0xa38   : > { %2286 = vrot.lane.b32.xlu1 %v3927_v4, %s3534_s3 }
 0xa3c   : > { %2290 = vrot.lane.b32.xlu1 %v3929_v6, %s3534_s3 }
 0xa40   : > { %2189 = vrot.lane.b32.xlu1 %v3873_v19, %s3533_s1 }
 0xa44   : > { %2187 = vrot.lane.b32.xlu1 %v3877_v21, %s3531_s26  ;;  %s3536_s26 = smov 72  }
 0xa5f   : > { %v2021_v43 = vpop.f32.mrf.mxu1 }
 0xa60   : > { %v2022_v45 = vadd.f32 %v3945_v12, %v2021_v43 }
 0xa61   : > { %v3023_v46 = vpop.f32.mrf.mxu1 }
 0xa62   : > { %v2025_v47 = vadd.f32 %v2022_v45, %v1921_v44 }
 0xa64   : > { %v2026_v48 = vsel %vm1149_vm3, %v2025_v47, -inf }
 0xa65   : > { %2027 = vmax.xlane.f32.xlu0 %v2026_v48 }
 0xaa6   : > { %v2277_v21 = vpop.permute.xlu1 %2276 }
 0xaa7   : > { %v2279_v52 = vsel %vm1034_vm4, %v2277_v21, 0.0 }
 0xaaa   : > { %v2287_v54 = vpop.permute.xlu1 %2286 }
 0xaae   : > { %v2291_v56 = vpop.permute.xlu1 %2290 }
 0xab2   : > { %v2190_v60 = vpop.permute.xlu1 %2189 }
 0xab6   : > { %v2188_v62 = vpop.permute.xlu1 %2187 }
 0xaee   : > { %v2028_v49 = vpop.xlane.xlu0 %2027 }
 0xaef   : > { %v2029_v50 = vsub.f32 %v2025_v47, %v2028_v49  ;;  %v2574_v49 = vld [vmem:[%s4167_s20 + $0x18] sm:$0xff] }
 0xaf1   : > { %v2030_v4 = vmul.f32 1.442695, %v2029_v50  ;;  %v2573_v50 = vld [vmem:[%s4167_s20 + $0x10] sm:$0xff] }
 0xaf3   : > { %3215 = vpow2.f32 %v2030_v4  ;;  %v2571_v4 = vld [vmem:[%s4167_s20] sm:$0xff] }
 0xb00   : > { %v3216_v6 = vpop.eup %3215 }
 0xb01   : > { %v2032_v51 = vsel %vm1149_vm3, %v3216_v6, 0.0 }
 0xb02   : > { %2033 = vadd.xlane.f32.xlu0 %v2032_v51 }
 0xb18   : > { %2037 = vrot.lane.b32.xlu0 %v3873_v19, %s3535_s22 }
 0xb37   : > { %2280 = vadd.xlane.f32.xlu0 %v2279_v52 }
 0xb8b   : > { %v2034_v53 = vpop.xlane.xlu0 %2033 }
 0xb8c   : > { %3217 = vrcp.f32 %v2034_v53  ;;  %v2864_v53 = vld [vmem:[%s4165_s18] ss:$0 sm:$0xff] }
 0xb8f   : > { %v2038_v55 = vpop.permute.xlu0 %2037 }
 0xb90   : > { %3025 = vmatpush3.msra.mxu0 %v2038_v55  ;;  %v2865_v55 = vld [vmem:[%s4166_s19] ss:$0 sm:$0xff] }
 0xb91   : > { %3034 = vmatprep.subr.mxu0 %v3525_v0 }
 0xb99   : > { %v3218_v59 = vpop.eup %3217 }
 0xb9a   : > { %v2036_v61 = vmul.f32 %v3218_v59, %v3216_v6 }
 0xb9c   : > { %3027 = vmatmul.mubr.msk.f32.vlgmr.msra.gmra.mxu0 %vm1149_vm3, %v2036_v61 }
 0xb9d   : > { %3035 = vmatpush3.xpose.msk.msra.mxu0 %vm1149_vm3, %v2190_v60  ;;  %3036 = vmatprep.mubr.msk.f32.mxu0 %vm3526_vm0, %v3525_v0 }
 0xb9e   : > { %3046 = vmatprep.subr.mxu0 %v3525_v0 }
 0xba0   : > { %3037 = vmatmul.mubr.msk.f32.vlgmr.msra.gmra.mxu0 %vm1149_vm3, %v2188_v62 }
 0xba1   : > { %3048 = vmatprep.mubr.msk.f32.mxu0 %vm3526_vm0, %v3525_v0 }
 0xbc0   : > { %v2281_v63 = vpop.xlane.xlu0 %2280 }
 0xbc1   : > { %v2282_v1 = vmul.f32 0.0625, %v2281_v63 }
 0xbc3   : > { %v2283_v2 = vadd.f32 1e-05, %v2282_v1 }
 0xbc5   : > { %3219 = vrsqrt.f32 %v2283_v2 }
 0xbd2   : > { %v3220_v5 = vpop.eup %3219 }
 0xbd3   : > { %v2285_v7 = vmul.f32 %v3220_v5, %v2273_v41 }
 0xbd5   : > { %v2289_v8 = vmul.f32 %v2287_v54, %v2285_v7 }
 0xbd7   : > { %v2293_v9 = vadd.f32 %v2291_v56, %v2289_v8 }
 0xbd9   : > { %2295 = vrot.lane.b32.xlu0 %v2293_v9, %s3533_s1  ;;  %s773_s1 = sand.u32 1, %s3507_s28  }
 0xbda   : > { %s2828_s3 = sshll.u32 %s773_s1, 3  ;;  %s2657_s0 = scalar_lea.sflag [#allocation4], %s773_s1 }
 0xc4b   : > { %v2296_v14 = vpop.permute.xlu0 %2295 }
 0xc5c   : > { %v2109_v11 = vpop.f32.mrf.mxu0 }
 0xc5d   : > { %3032 = vmatmul.mubr.msk.f32.vlgmr.msra.gmra.mxu1 %vm1149_vm3, %v2109_v11 }
 0xc5e   : > { %3040 = vmatpush3.msra.mxu1 %v3914_v57  ;;  %v3028_v13 = vpop.f32.mrf.mxu0  ;;  %3043 = vmatprep.mubr.msk.f32.mxu1 %vm3526_vm0, %v3525_v0  ;;  %v1840_v57 = vadd.f32 %v4013_v30, %v4022_v35 }
 0xc5f   : > { %3041 = vmatprep.subr.mxu1 %v3525_v0 }
 0xc60   : > { %3042 = vmatpush3.msra.mxu1 %v3919_v58  ;;  %v2261_v15 = vpop.f32.mrf.mxu0 }
 0xc61   : > { %3044 = vmatmul.mubr.msk.f32.vlgmr.msra.gmra.mxu1 %vm1034_vm4, %v2296_v14  ;;  %3051 = vmatprep.subr.mxu1 %v3525_v0  ;;  %v2265_v23 = vmul.f32 0.35355338, %v2261_v15 }
 0xc62   : > { %v3038_v16 = vpop.f32.mrf.mxu0  ;;  %3053 = vmatprep.mubr.msk.f32.mxu1 %vm3526_vm0, %v3525_v0 }
 0xd1d   : > { %v2182_v17 = vpop.f32.mrf.mxu1 }
 0xd1e   : > { %v2186_v18 = vadd.f32 %v2182_v17, %v1840_v57 }
 0xd1f   : > { %v3033_v20 = vpop.f32.mrf.mxu1 }
 0xd21   : > { %v2365_v22 = vpop.f32.mrf.mxu1 }
 0xd22   : > { %v2366_v24 = vadd.f32 %v3945_v12, %v2365_v22  ;;  %v1148_v12 = vld [vmem:[%s4163_s16 + $0x18] sm:$0xff] }
 0xd23   : > { %v3045_v58 = vpop.f32.mrf.mxu1  ;;  %3052 = vmatpush3.msra.mxu1 %v1148_v12 }
 0xd24   : > { %v2369_v25 = vadd.f32 %v2366_v24, %v2265_v23 }
 0xd26   : > { %v2370_v26 = vsel %vm1149_vm3, %v2369_v25, -inf }
 0xd27   : > { %2371 = vmax.xlane.f32.xlu1 %v2370_v26 }
 0xd38   : > { %2381 = vrot.lane.b32.xlu1 %v3873_v19, %s3536_s26  ;;  %s775_s26 = scalar_lea.vmem [#allocation16], %s2828_s3  ;;  %s3439_s3 = sshll.u32 %s3537_s4, 4  ;;  %s3440_s3 = int_to_ptr.vmem [resolvable:$false] %s3439_s3 }
 0xd39   : > { %s2670_s5 = sshll.u32 %s775_s26, 4  ;;  %s3441_s22 = scalar_lea.vmem %s3440_s3, 256  ;;  %s2671_s5 = int_to_ptr.vmem [resolvable:$true] %s2670_s5 }
 0xd3a   : > { %s3435_s2 = scalar_lea.vmem %s2671_s5, 128  ;;  %p3442_p13 = scmp.lt.s32.totalorder %s2671_s5, %s3440_s3 }
 0xd3b   : > { %p3436_p6 = scmp.ne.s32.totalorder %s2671_s5, %s3435_s2  ;;  %p3443_p8 = scmp.lt.s32.totalorder %s3441_s22, %s3435_s2 }
 0xd3d   : > { %p3437_p4 = pnand %p3436_p6, %p4225_p10  ;;  %p3444_p11 = por %p3443_p8, %p3442_p13 }
 0xd3f   : > { %p3438_p7 = pneg %p3437_p4 }
 0xd41   : > { %p3445_p0 = pnand %p3444_p11, %p3438_p7 }
 0xdb0   : > { %v2372_v27 = vpop.xlane.xlu1 %2371 }
 0xdb1   : > { %v2373_v28 = vsub.f32 %v2369_v25, %v2372_v27 }
 0xdb3   : > { %v2374_v29 = vmul.f32 1.442695, %v2373_v28 }
 0xdb4   : > { %v2382_v31 = vpop.permute.xlu1 %2381 }
 0xdb5   : > { %3221 = vpow2.f32 %v2374_v29  ;;  %3047 = vmatpush3.msra.mxu0 %v2382_v31 }
 0xdb6   : > { %3056 = vmatprep.subr.mxu0 %v3525_v0 }
 0xdc2   : > { %v3222_v30 = vpop.eup %3221 }
 0xdc3   : > { %v2376_v32 = vsel %vm1149_vm3, %v3222_v30, 0.0 }
 0xdc4   : > { %2377 = vadd.xlane.f32.xlu0 %v2376_v32 }
 0xe4d   : > { %v2378_v33 = vpop.xlane.xlu0 %2377 }
 0xe4e   : > { %3223 = vrcp.f32 %v2378_v33 }
 0xe5b   : > { %v3224_v19 = vpop.eup %3223 }
 0xe5c   : > { %v2380_v34 = vmul.f32 %v3224_v19, %v3222_v30 }
 0xe5e   : > { %3049 = vmatmul.mubr.msk.f32.vlgmr.msra.gmra.mxu0 %vm1149_vm3, %v2380_v34 }
 0xe5f   : > { %3064 = vmatprep.mubr.msk.f32.mxu0 %vm3526_vm0, %v3525_v0  ;;  %3057 = vmatpush3.msra.mxu0 %v2574_v49 }
 0xe60   : > { %3058 = vmatprep.subr.mxu0 %v3525_v0 }
 0xe61   : > { %3059 = vmatpush3.msra.mxu0 %v2573_v50 }
 0xe62   : > { %3060 = vmatprep.subr.mxu0 %v3525_v0 }
 0xf1e   : > { %v2453_v35 = vpop.f32.mrf.mxu0 }
 0xf1f   : > { %3054 = vmatmul.mubr.msk.f32.vlgmr.msra.gmra.mxu1 %vm1149_vm3, %v2453_v35 }
 0xf20   : > { %v3050_v36 = vpop.f32.mrf.mxu0 }
 0xfdf   : > { %v2526_v37 = vpop.f32.mrf.mxu1 }
 0xfe0   : > { %v2530_v39 = vadd.f32 %v2526_v37, %v2186_v18 }
 0xfe1   : > { %v3055_v40 = vpop.f32.mrf.mxu1 }
 0xfe2   : > { %v2538_v41 = vadd.f32 %v2863_v38, %v2530_v39 }
 0xfe4   : > { %v2539_v42 = vadd.f32 %v2538_v41, %v3845_v10  ;;  %v2572_v10 = vld [vmem:[%s4167_s20 + $0x8] sm:$0xff] }
 0xfe5   : > { %3061 = vmatpush3.msra.mxu0 %v2572_v10 }
 0xfe6   : > { %v2542_v43 = vsel %vm792_vm2, %v2539_v42, 0.0  ;;  %3062 = vmatprep.subr.mxu0 %v3525_v0  ;;  %v2866_v0 = vld [vmem:[%s4168_s21] ss:$0 sm:$0xff] }
 0xfe7   : > { %2543 = vadd.xlane.f32.xlu0 %v2542_v43  ;;  %3063 = vmatpush3.msra.mxu0 %v2571_v4 }
0x1070   : > { %v2544_v44 = vpop.xlane.xlu0 %2543 }
0x1071   : > { %v2546_v45 = vmul.f32 0.03125, %v2544_v44 }
0x1073   : > { %v2547_v46 = vsub.f32 %v2539_v42, %v2546_v45 }
0x1075   : > { %v2548_v47 = vmul.f32 %v2547_v46, %v2547_v46 }
0x1077   : > { %v2549_v48 = vsel %vm792_vm2, %v2548_v47, 0.0 }
0x1078   : > { %2550 = vadd.xlane.f32.xlu1 %v2549_v48 }
0x1101   : > { %v2551_v6 = vpop.xlane.xlu1 %2550 }
0x1102   : > { %v2552_v51 = vmul.f32 0.03125, %v2551_v6 }
0x1104   : > { %v2553_v21 = vadd.f32 1e-05, %v2552_v51 }
0x1106   : > { %3225 = vrsqrt.f32 %v2553_v21 }
0x1113   : > { %v3226_v52 = vpop.eup %3225 }
0x1114   : > { %v2555_v54 = vmul.f32 %v3226_v52, %v2547_v46 }
0x1116   : > { %v2562_v56 = vmul.f32 %v2864_v53, %v2555_v54 }
0x1118   : > { %v2569_v59 = vadd.f32 %v2865_v55, %v2562_v56 }
0x111a   : > { %v2570_v60 = vmax.f32 %v2569_v59, 0.0 }
0x111c   : > { %3065 = vmatmul.mubr.msk.f32.vlgmr.msra.gmra.mxu0 %vm792_vm2, %v2570_v60 }
0x11dc   : > { %v2651_v61 = vpop.f32.mrf.mxu0 }
0x11dd   : > { %v2652_v62 = vadd.f32 %v2866_v0, %v2651_v61 }
0x11de   : > { %v3066_v63 = vpop.f32.mrf.mxu0 }
0x11df   : > { %2655 = vst.msk [vmem:[%s775_s26] sm:$0xff] %vm1034_vm4, %v2652_v62 }
0x11e0   : > { %3448 = shalt.err (!%p3445_p0)
}
0x11e1   : > { %s3449_s30 = scalar_lea.hbm %s4111_s7, 128  ;;  %s3453_s26 = scalar_lea.hbm %s4224_s23, 256 }
0x11e2   : > { %p3450_p12 = scmp.ne.s32.totalorder %s4111_s7, %s3449_s30  ;;  %p3454_p9 = scmp.lt.s32.totalorder %s4111_s7, %s4224_s23 }
0x11e3   : > { %p3455_p3 = scmp.lt.s32.totalorder %s3453_s26, %s3449_s30 }
0x11e4   : > { %p3451_p1 = pnand %p3450_p12, %p4225_p10 }
0x11e5   : > { %p3456_p5 = por %p3455_p3, %p3454_p9 }
0x11e6   : > { %p3452_p2 = pneg %p3451_p1 }
0x11e8   : > { %p3457_p6 = pnand %p3456_p5, %p3452_p2 }
0x11ea   : > { %3460 = shalt.err (!%p3457_p6)
}
0x11eb   : > { %3099 = dma.vmem_to_hbm [thread:$0]  (%p4225_p10), %s2671_s5, 128, %s4111_s7, %s2657_s0  }
0x11ec PF: > { %s4226_s2 = sld [smem:[#allocation25_spill]] }
0x11ed   : > { %s4227_s4 = sld [smem:[#allocation23_spill]] }
0x11ee   : > { %s4228_s3 = sld [smem:[#allocation28_spill]] }
0x11f2   : > { %p3146_p4 = scmp.ge.s32.totalorder %s4226_s2, 2 }
0x11f3   : > { %s2682_s22 = sand.u32 1, %s4227_s4  }
0x11f4   : > { %p4229_p7 = scmp.ne.s32.totalorder %s4228_s3, 0  ;;  %s2683_s1 = scalar_lea.sflag [#allocation4], %s2682_s22 }
0x11f6   : > { %p3127_p13 = pnand %p3146_p4, %p4229_p7 }
0x11f8   : > { %p3128_p8 = pneg %p3127_p13 }
0x11fa   : > { %3498 = dma.done.wait (%p3128_p8), %s2683_s1, 128  }
0x11fb   : > { %3500 = vsyncadd (%p3128_p8), %s2683_s1, 4294967168  ;;  %s4230_s30 = sld [smem:[#allocation26_spill]]  ;;  %s4233_s3 = smov %s3507_s28 }
0x11fc   : > { %s4231_s25 = sld [smem:[#allocation24_spill]] }
0x11fd   : > { %s4232_s29 = sld [smem:[#allocation27_spill]] }
0x1201   : > { %p37_p11 = scmp.ge.s32.totalorder %s4230_s30, 4  }
0x1202   : > { %s4234_s28 = smov %s4231_s25 }
0x1203   :  { %39 = sbr.rel (!%p37_p11) target bundleno = 18 (0x12), region = 176 }
0x1208   :  { %2688 = vsyncpa [#allocation3], 1 }
0x1209   :  { %2690 = vsyncpa [#allocation3 + $0x1], 1 }
0x120a   :  { %2691 = vsyncpa [#allocation6], 1 }
0x120b   :  { %2692 = vsyncpa [#allocation9], 1 }
0x120c   :  { %2693 = vsyncpa [#allocation12], 1 }
0x120d   :  { %2694 = vsyncpa [#allocation15], 1 }
0x120e   :  { %2695 = vsyncpa [#allocation4], 1 }
0x120f   :  { %2697 = vsyncpa [#allocation4 + $0x1], 1 }

</bundles_post_ra>
